<compile_context>
chip_gen: v5e
topology: v5e:2x2
jax: 0.10.0
libtpu: 0.0.40
codegen_flags: <defaults>
</compile_context>

<pallas_src>
import functools

import jax
import jax.numpy as jnp
from jax.experimental import pallas as pl
from jax.experimental.pallas import tpu as pltpu

EPS = 1e-5
LANE = 128   # lane-dense channel tile (128 native on v5e; fine on v6e/v7x)


def _round_up(x, m):
    return (x + m - 1) // m * m


# --------------------------------------------------------------------------- #
# In-kernel helpers (traced inside the Pallas kernels)
# --------------------------------------------------------------------------- #
def _patch_matrix(xp, h_out, w_out, stride):
    """im2col for a 3x3 conv from one padded (Hp, Wp, C) slab, kept in bf16.

    Returns an (h_out * w_out, 9 * C) matrix whose column blocks are ordered
    (kh, kw, c), matching an HWIO weight reshaped to (9 * C, C_out).  With C a
    multiple of 128 the lane-axis concatenation is tile-aligned.
    """
    c = xp.shape[-1]
    cols = []
    for kh in range(3):
        for kw in range(3):
            tap = jax.lax.slice(
                xp,
                (kh, kw, 0),
                (kh + stride * (h_out - 1) + 1,
                 kw + stride * (w_out - 1) + 1, c),
                (stride, stride, 1))
            cols.append(tap.reshape(h_out * w_out, c))
    return jnp.concatenate(cols, axis=-1)


def _sum_sumsq(y):
    """(2, C) stack of per-channel sum and sum-of-squares of an (M, C) f32 tile."""
    return jnp.concatenate(
        [jnp.sum(y, axis=0, keepdims=True),
         jnp.sum(y * y, axis=0, keepdims=True)], axis=0)


def _bn_scale_shift(stats, gamma, beta, m_total, eps):
    """BatchNorm scale/shift from accumulated (sum, sumsq); single-pass variance."""
    inv_m = 1.0 / m_total
    mean = stats[0:1, :] * inv_m
    var = stats[1:2, :] * inv_m - mean * mean
    scale = gamma * jax.lax.rsqrt(var + eps)
    shift = beta - mean * scale
    return scale, shift


# --------------------------------------------------------------------------- #
# Pallas kernels
# --------------------------------------------------------------------------- #
def _conv1_kernel(xp_ref, w1_ref, *rest, h_out, w_out, stride, has_proj):
    """conv1 (3x3, stride) + optional 1x1 projection conv; bf16 outputs + stats."""
    if has_proj:
        ws_ref, y1_ref, s1_ref, ys_ref, ss_ref = rest
    else:
        y1_ref, s1_ref = rest

    xp = xp_ref[0]                                            # (Hp, Wp, Cp_in) bf16
    cp_in = xp.shape[-1]
    patches = _patch_matrix(xp, h_out, w_out, stride)         # (HW, 9*Cp_in) bf16
    y1 = jnp.dot(patches, w1_ref[...],
                 preferred_element_type=jnp.float32)          # (HW, Cp_out) f32
    s1_ref[0] = _sum_sumsq(y1)                                # stats from f32 acc
    y1_ref[0] = y1.astype(y1_ref.dtype)                       # ship bf16 across HBM

    if has_proj:
        # 1x1 projection conv: its operand is exactly the center tap (kh=kw=1)
        # of the 3x3 patch matrix -> reuse the lane-aligned column block.
        xc = patches[:, 4 * cp_in:5 * cp_in]
        ys = jnp.dot(xc, ws_ref[...], preferred_element_type=jnp.float32)
        ss_ref[0] = _sum_sumsq(ys)
        ys_ref[0] = ys.astype(ys_ref.dtype)


def _bn1_relu_conv2_kernel(y1_ref, s1_ref, g1_ref, b1_ref, w2_ref,
                           y2_ref, s2_ref, *, h_out, w_out, m_total, eps):
    """BN1 (batch stats) + ReLU, then conv2 (3x3, stride 1) via in-VMEM taps."""
    cp = y1_ref.shape[-1]

    scale, shift = _bn_scale_shift(s1_ref[...], g1_ref[...], b1_ref[...],
                                   m_total, eps)
    # BN/ReLU math in f32 (bf16 * f32 promotes), then one cast for the MXU.
    act = jnp.maximum(y1_ref[0] * scale + shift, 0.0).astype(jnp.bfloat16)
    img = act.reshape(h_out, w_out, cp)

    # Zero-halo slab built as a value (aligned full tiles, no sub-window store).
    zrow = jnp.zeros((1, w_out, cp), jnp.bfloat16)
    zcol = jnp.zeros((h_out + 2, 1, cp), jnp.bfloat16)
    slab = jnp.concatenate(
        [zcol, jnp.concatenate([zrow, img, zrow], axis=0), zcol], axis=1)

    patches = _patch_matrix(slab, h_out, w_out, 1)            # (HW, 9*Cp) bf16
    y2 = jnp.dot(patches, w2_ref[...], preferred_element_type=jnp.float32)
    s2_ref[0] = _sum_sumsq(y2)
    y2_ref[0] = y2.astype(y2_ref.dtype)


def _bn2_add_relu_kernel(y2_ref, s2_ref, g2_ref, b2_ref, *rest,
                         m_total, eps, has_proj):
    """BN2 + shortcut (BN of projection conv, or identity) + add + final ReLU."""
    if has_proj:
        ys_ref, ss_ref, gs_ref, bs_ref, out_ref = rest
    else:
        xid_ref, out_ref = rest

    scale2, shift2 = _bn_scale_shift(s2_ref[...], g2_ref[...], b2_ref[...],
                                     m_total, eps)
    main = y2_ref[0] * scale2 + shift2                        # f32

    if has_proj:
        ssc, shc = _bn_scale_shift(ss_ref[...], gs_ref[...], bs_ref[...],
                                   m_total, eps)
        shortcut = ys_ref[0] * ssc + shc
    else:
        shortcut = xid_ref[0]                                 # identity, f32

    out_ref[0] = jnp.maximum(main + shortcut, 0.0)


# --------------------------------------------------------------------------- #
# Wrapper (layout-only glue: transpose / pad / reshape / dtype prep)
# --------------------------------------------------------------------------- #
def basic_block_forward(x_nchw, params, *, stride=1):
    n, c_in, h, w = x_nchw.shape
    c_out = params["w1"].shape[-1]
    h_out = (h + 2 - 3) // stride + 1
    w_out = (w + 2 - 3) // stride + 1
    hw = h_out * w_out
    m_total = float(n * hw)
    hp, wp = h + 2, w + 2
    has_proj = (stride != 1) or (c_in != c_out)

    # Channel padding to a lane-dense multiple of 128.  Padded gamma/beta rows
    # are zero, so padded channels stay exactly 0 through BN/ReLU/conv/residual.
    cp_in = _round_up(c_in, LANE)
    cp_out = _round_up(c_out, LANE)

    x_nhwc = jnp.transpose(x_nchw, (0, 2, 3, 1)).astype(jnp.float32)
    # One padded slab, shipped once in bf16; 3x3 taps are built inside kernel A.
    xp = jnp.pad(x_nhwc, ((0, 0), (1, 1), (1, 1),
                          (0, cp_in - c_in))).astype(jnp.bfloat16)

    def pack_weight(wk):
        """HWIO weight -> (kh*kw*Cp_in, Cp_out) bf16 with zero channel padding."""
        kh, kw, ci, co = wk.shape
        cpi = _round_up(ci, LANE)
        wkp = jnp.pad(wk, ((0, 0), (0, 0), (0, cpi - ci), (0, cp_out - co)))
        return wkp.reshape(kh * kw * cpi, cp_out).astype(jnp.bfloat16)

    def pack_vec(v):
        return jnp.pad(v.reshape(1, -1),
                       ((0, 0), (0, cp_out - c_out))).astype(jnp.float32)

    w1p = pack_weight(params["w1"])                # (9*cp_in,  cp_out)
    w2p = pack_weight(params["w2"])                # (9*cp_out, cp_out)
    g1, b1 = pack_vec(params["g1"]), pack_vec(params["b1"])
    g2, b2 = pack_vec(params["g2"]), pack_vec(params["b2"])

    raw_shape = jax.ShapeDtypeStruct((n, hw, cp_out), jnp.bfloat16)
    stat_shape = jax.ShapeDtypeStruct((n, 2, cp_out), jnp.float32)
    img_spec = pl.BlockSpec((1, hw, cp_out), lambda i: (i, 0, 0))
    stat_out_spec = pl.BlockSpec((1, 2, cp_out), lambda i: (i, 0, 0))
    stat_in_spec = pl.BlockSpec((2, cp_out), lambda i: (0, 0))
    vec_spec = pl.BlockSpec((1, cp_out), lambda i: (0, 0))
    parallel = pltpu.CompilerParams(dimension_semantics=("parallel",))

    # ---- kernel A: conv1 (+ projection conv), bf16 outputs + per-image stats --
    a_in_specs = [pl.BlockSpec((1, hp, wp, cp_in), lambda i: (i, 0, 0, 0)),
                  pl.BlockSpec((9 * cp_in, cp_out), lambda i: (0, 0))]
    a_args = [xp, w1p]
    a_out_shape = [raw_shape, stat_shape]
    a_out_specs = [img_spec, stat_out_spec]
    if has_proj:
        wsp = pack_weight(params["ws"])            # (cp_in, cp_out)
        a_in_specs.append(pl.BlockSpec((cp_in, cp_out), lambda i: (0, 0)))
        a_args.append(wsp)
        a_out_shape += [raw_shape, stat_shape]
        a_out_specs += [img_spec, stat_out_spec]

    a_out = pl.pallas_call(
        functools.partial(_conv1_kernel, h_out=h_out, w_out=w_out,
                          stride=stride, has_proj=has_proj),
        grid=(n,),
        in_specs=a_in_specs,
        out_shape=tuple(a_out_shape),
        out_specs=tuple(a_out_specs),
        compiler_params=parallel,
    )(*a_args)
    if has_proj:
        y1_raw, s1_per, ys_raw, ss_per = a_out
    else:
        y1_raw, s1_per = a_out

    # Tiny (N,2,C) -> (2,C) stats reduction between the barriers.
    stats1 = jnp.sum(s1_per, axis=0)
    if has_proj:
        stats_s = jnp.sum(ss_per, axis=0)

    # ---- kernel B: BN1 + ReLU + conv2 ---------------------------------------
    y2_raw, s2_per = pl.pallas_call(
        functools.partial(_bn1_relu_conv2_kernel, h_out=h_out, w_out=w_out,
                          m_total=m_total, eps=EPS),
        grid=(n,),
        in_specs=[img_spec, stat_in_spec, vec_spec, vec_spec,
                  pl.BlockSpec((9 * cp_out, cp_out), lambda i: (0, 0))],
        out_shape=(raw_shape, stat_shape),
        out_specs=(img_spec, stat_out_spec),
        compiler_params=parallel,
    )(y1_raw, stats1, g1, b1, w2p)
    stats2 = jnp.sum(s2_per, axis=0)

    # ---- kernel C: BN2 + shortcut BN / identity + add + ReLU ----------------
    c_in_specs = [img_spec, stat_in_spec, vec_spec, vec_spec]
    c_args = [y2_raw, stats2, g2, b2]
    if has_proj:
        gs, bs = pack_vec(params["gs"]), pack_vec(params["bs"])
        c_in_specs += [img_spec, stat_in_spec, vec_spec, vec_spec]
        c_args += [ys_raw, stats_s, gs, bs]
    else:
        # Identity shortcut: x is already at output resolution; stream in f32
        # (it does not pass through a conv, keep residual add full precision).
        xid = jnp.pad(x_nhwc, ((0, 0), (0, 0), (0, 0),
                               (0, cp_out - c_out))).reshape(n, hw, cp_out)
        c_in_specs.append(pl.BlockSpec((1, hw, cp_out), lambda i: (i, 0, 0)))
        c_args.append(xid)

    out3d = pl.pallas_call(
        functools.partial(_bn2_add_relu_kernel, m_total=m_total, eps=EPS,
                          has_proj=has_proj),
        grid=(n,),
        in_specs=c_in_specs,
        out_shape=jax.ShapeDtypeStruct((n, hw, cp_out), jnp.float32),
        out_specs=img_spec,
        compiler_params=parallel,
    )(*c_args)

    out_nhwc = out3d.reshape(n, h_out, w_out, cp_out)[..., :c_out]
    return jnp.transpose(out_nhwc, (0, 3, 1, 2))               # back to NCHW


# --------------------------------------------------------------------------- #
# Pure-JAX reference (mirrors the kernel's bf16-operand / f32-accumulate policy)
# --------------------------------------------------------------------------- #
def _ref_basic_block(x_nchw, params, *, stride=1):
    x = jnp.transpose(x_nchw, (0, 2, 3, 1)).astype(jnp.float32)
    c_in = x.shape[-1]
    c_out = params["w1"].shape[-1]
    has_proj = (stride != 1) or (c_in != c_out)

    def conv(a, w, s, pad):
        return jax.lax.conv_general_dilated(
            a.astype(jnp.bfloat16), w.astype(jnp.bfloat16), (s, s), pad,
            dimension_numbers=("NHWC", "HWIO", "NHWC"),
            preferred_element_type=jnp.float32)

    def bn(a, g, b):
        mean = jnp.mean(a, axis=(0, 1, 2), keepdims=True)
        var = jnp.mean((a - mean) ** 2, axis=(0, 1, 2), keepdims=True)
        return ((a - mean) * jax.lax.rsqrt(var + EPS)
                * g.reshape(1, 1, 1, -1) + b.reshape(1, 1, 1, -1))

    y = jax.nn.relu(bn(conv(x, params["w1"], stride, [(1, 1), (1, 1)]),
                       params["g1"], params["b1"]))
    y = bn(conv(y, params["w2"], 1, [(1, 1), (1, 1)]), params["g2"], params["b2"])
    if has_proj:
        sc = bn(conv(x, params["ws"], stride, [(0, 0), (0, 0)]),
                params["gs"], params["bs"])
    else:
        sc = x
    return jnp.transpose(jax.nn.relu(y + sc), (0, 3, 1, 2))


# --------------------------------------------------------------------------- #
if __name__ == "__main__":
    key = jax.random.PRNGKey(0)

    # (N, C_in, C_out, H, W, stride): identity-shortcut and projection-shortcut paths.
    configs = [(2, 8, 8, 16, 16, 1),
               (2, 4, 8, 16, 16, 1)]

    for idx, (N, C_IN, C_OUT, H, W, STRIDE) in enumerate(configs):
        key, k_x, k1, k2, k3 = jax.random.split(key, 5)
        x = jax.random.normal(k_x, (N, C_IN, H, W), dtype=jnp.float32)

        params = {
            # conv weights stored in HWIO (equivalent to PyTorch OIHW after transpose)
            "w1": 0.1 * jax.random.normal(k1, (3, 3, C_IN, C_OUT), jnp.float32),
            "g1": jnp.ones((C_OUT,), jnp.float32),
            "b1": jnp.zeros((C_OUT,), jnp.float32),
            "w2": 0.1 * jax.random.normal(k2, (3, 3, C_OUT, C_OUT), jnp.float32),
            "g2": jnp.ones((C_OUT,), jnp.float32),
            "b2": jnp.zeros((C_OUT,), jnp.float32),
        }
        if STRIDE != 1 or C_IN != C_OUT:
            params.update({
                "ws": 0.1 * jax.random.normal(k3, (1, 1, C_IN, C_OUT), jnp.float32),
                "gs": jnp.ones((C_OUT,), jnp.float32),
                "bs": jnp.zeros((C_OUT,), jnp.float32),
            })

        out = jax.block_until_ready(basic_block_forward(x, params, stride=STRIDE))
        ref = jax.block_until_ready(_ref_basic_block(x, params, stride=STRIDE))

        h_out = (H + 2 - 3) // STRIDE + 1
        w_out = (W + 2 - 3) // STRIDE + 1
        assert out.shape == ref.shape == (N, C_OUT, h_out, w_out)
        max_diff = float(jnp.max(jnp.abs(out - ref)))
        # Tolerance reflects the mixed-precision policy (bf16 MXU operands and
        # bf16 inter-kernel activations, f32 accumulate / BN / residual math).
        assert bool(jnp.allclose(out, ref, rtol=2e-2, atol=3e-2)), (
            "config %d mismatch, max abs diff = %g" % (idx, max_diff))

    print("KERNEL_OK")
</pallas_src>

<mosaic_0001>
module attributes {stable_mosaic.version = 11 : i64} {
  func.func @_conv1_kernel(%arg0: i32, %arg1: memref<1x18x18x128xbf16, #tpu.memory_space<vmem>>, %arg2: memref<1152x128xbf16, #tpu.memory_space<vmem>>, %arg3: memref<1x256x128xbf16, #tpu.memory_space<vmem>>, %arg4: memref<1x2x128xf32, #tpu.memory_space<vmem>>) attributes {dimension_semantics = [#tpu.dimension_semantics<parallel>], iteration_bounds = array<i64: 2>, scalar_prefetch = 0 : i64, scratch_operands = 0 : i64, tpu.core_type = #tpu.core_type<tc>, window_params = [{transform_indices = @transform_0, window_bounds = array<i64: 1, 18, 18, 128>}, {pipeline_mode = #tpu.pipeline_mode<synchronous>, transform_indices = @transform_1, window_bounds = array<i64: 1152, 128>}, {transform_indices = @transform_2, window_bounds = array<i64: 1, 256, 128>}, {transform_indices = @transform_3, window_bounds = array<i64: 1, 2, 128>}]} {
    %c0 = arith.constant 0 : index
    %c0_0 = arith.constant 0 : index
    %c0_1 = arith.constant 0 : index
    %c0_2 = arith.constant 0 : index
    %0 = vector.load %arg1[%c0, %c0_0, %c0_1, %c0_2] : memref<1x18x18x128xbf16, #tpu.memory_space<vmem>>, vector<1x18x18x128xbf16>
    %1 = vector.shape_cast %0 : vector<1x18x18x128xbf16> to vector<18x18x128xbf16>
    %2 = vector.extract_strided_slice %1 {offsets = [0, 0, 0], sizes = [16, 16, 128], strides = [1, 1, 1]} : vector<18x18x128xbf16> to vector<16x16x128xbf16>
    %3 = vector.shape_cast %2 : vector<16x16x128xbf16> to vector<256x128xbf16>
    %4 = vector.extract_strided_slice %1 {offsets = [0, 1, 0], sizes = [16, 16, 128], strides = [1, 1, 1]} : vector<18x18x128xbf16> to vector<16x16x128xbf16>
    %5 = vector.shape_cast %4 : vector<16x16x128xbf16> to vector<256x128xbf16>
    %6 = vector.extract_strided_slice %1 {offsets = [0, 2, 0], sizes = [16, 16, 128], strides = [1, 1, 1]} : vector<18x18x128xbf16> to vector<16x16x128xbf16>
    %7 = vector.shape_cast %6 : vector<16x16x128xbf16> to vector<256x128xbf16>
    %8 = vector.extract_strided_slice %1 {offsets = [1, 0, 0], sizes = [16, 16, 128], strides = [1, 1, 1]} : vector<18x18x128xbf16> to vector<16x16x128xbf16>
    %9 = vector.shape_cast %8 : vector<16x16x128xbf16> to vector<256x128xbf16>
    %10 = vector.extract_strided_slice %1 {offsets = [1, 1, 0], sizes = [16, 16, 128], strides = [1, 1, 1]} : vector<18x18x128xbf16> to vector<16x16x128xbf16>
    %11 = vector.shape_cast %10 : vector<16x16x128xbf16> to vector<256x128xbf16>
    %12 = vector.extract_strided_slice %1 {offsets = [1, 2, 0], sizes = [16, 16, 128], strides = [1, 1, 1]} : vector<18x18x128xbf16> to vector<16x16x128xbf16>
    %13 = vector.shape_cast %12 : vector<16x16x128xbf16> to vector<256x128xbf16>
    %14 = vector.extract_strided_slice %1 {offsets = [2, 0, 0], sizes = [16, 16, 128], strides = [1, 1, 1]} : vector<18x18x128xbf16> to vector<16x16x128xbf16>
    %15 = vector.shape_cast %14 : vector<16x16x128xbf16> to vector<256x128xbf16>
    %16 = vector.extract_strided_slice %1 {offsets = [2, 1, 0], sizes = [16, 16, 128], strides = [1, 1, 1]} : vector<18x18x128xbf16> to vector<16x16x128xbf16>
    %17 = vector.shape_cast %16 : vector<16x16x128xbf16> to vector<256x128xbf16>
    %18 = vector.extract_strided_slice %1 {offsets = [2, 2, 0], sizes = [16, 16, 128], strides = [1, 1, 1]} : vector<18x18x128xbf16> to vector<16x16x128xbf16>
    %19 = vector.shape_cast %18 : vector<16x16x128xbf16> to vector<256x128xbf16>
    %20 = tpu.concatenate %3, %5, %7, %9, %11, %13, %15, %17, %19 in 1 : vector<256x128xbf16>, vector<256x128xbf16>, vector<256x128xbf16>, vector<256x128xbf16>, vector<256x128xbf16>, vector<256x128xbf16>, vector<256x128xbf16>, vector<256x128xbf16>, vector<256x128xbf16> -> vector<256x1152xbf16>
    %c0_3 = arith.constant 0 : index
    %c0_4 = arith.constant 0 : index
    %21 = vector.load %arg2[%c0_3, %c0_4] : memref<1152x128xbf16, #tpu.memory_space<vmem>>, vector<1152x128xbf16>
    %cst = arith.constant dense<0.000000e+00> : vector<256x128xf32>
    %22 = tpu.matmul %20, %21, %cst {dimension_numbers = #tpu.dot_dimension_numbers<[1], [0], [0], [1], [0, 0, 1, 1], [], []>} : vector<256x1152xbf16>, vector<1152x128xbf16>, vector<256x128xf32> -> vector<256x128xf32>
    %cst_5 = arith.constant dense<0.000000e+00> : vector<128xf32>
    %23 = vector.multi_reduction <add>, %22, %cst_5 [0] : vector<256x128xf32> to vector<128xf32>
    %24 = vector.shape_cast %23 : vector<128xf32> to vector<1x128xf32>
    %25 = arith.mulf %22, %22 : vector<256x128xf32>
    %cst_6 = arith.constant dense<0.000000e+00> : vector<128xf32>
    %26 = vector.multi_reduction <add>, %25, %cst_6 [0] : vector<256x128xf32> to vector<128xf32>
    %27 = vector.shape_cast %26 : vector<128xf32> to vector<1x128xf32>
    %28 = tpu.concatenate %24, %27 in 0 : vector<1x128xf32>, vector<1x128xf32> -> vector<2x128xf32>
    %c0_7 = arith.constant 0 : index
    %c0_8 = arith.constant 0 : index
    %c0_9 = arith.constant 0 : index
    %29 = vector.load %arg4[%c0_7, %c0_8, %c0_9] : memref<1x2x128xf32, #tpu.memory_space<vmem>>, vector<1x2x128xf32>
    %30 = vector.shape_cast %29 : vector<1x2x128xf32> to vector<2x128xf32>
    %31 = vector.shape_cast %28 : vector<2x128xf32> to vector<1x2x128xf32>
    tpu.vector_store %arg4[%c0_7, %c0_8, %c0_9], %31 {strides = array<i32>} : memref<1x2x128xf32, #tpu.memory_space<vmem>>, vector<1x2x128xf32>,
    %32 = arith.truncf %22 : vector<256x128xf32> to vector<256x128xbf16>
    %c0_10 = arith.constant 0 : index
    %c0_11 = arith.constant 0 : index
    %c0_12 = arith.constant 0 : index
    %33 = vector.load %arg3[%c0_10, %c0_11, %c0_12] : memref<1x256x128xbf16, #tpu.memory_space<vmem>>, vector<1x256x128xbf16>
    %34 = vector.shape_cast %33 : vector<1x256x128xbf16> to vector<256x128xbf16>
    %35 = vector.shape_cast %32 : vector<256x128xbf16> to vector<1x256x128xbf16>
    tpu.vector_store %arg3[%c0_10, %c0_11, %c0_12], %35 {strides = array<i32>} : memref<1x256x128xbf16, #tpu.memory_space<vmem>>, vector<1x256x128xbf16>,
    return
  }
  func.func @transform_0(%arg0: i32) -> (i32, i32, i32, i32) {
    %c0_i32 = arith.constant 0 : i32
    %c0_i32_0 = arith.constant 0 : i32
    %c0_i32_1 = arith.constant 0 : i32
    %c0_i32_2 = arith.constant 0 : i32
    return %arg0, %c0_i32, %c0_i32_0, %c0_i32_1 : i32, i32, i32, i32
  }
  func.func @transform_1(%arg0: i32) -> (i32, i32) {
    %c0_i32 = arith.constant 0 : i32
    %c0_i32_0 = arith.constant 0 : i32
    %c0_i32_1 = arith.constant 0 : i32
    return %c0_i32, %c0_i32_0 : i32, i32
  }
  func.func @transform_2(%arg0: i32) -> (i32, i32, i32) {
    %c0_i32 = arith.constant 0 : i32
    %c0_i32_0 = arith.constant 0 : i32
    %c0_i32_1 = arith.constant 0 : i32
    return %arg0, %c0_i32, %c0_i32_0 : i32, i32, i32
  }
  func.func @transform_3(%arg0: i32) -> (i32, i32, i32) {
    %c0_i32 = arith.constant 0 : i32
    %c0_i32_0 = arith.constant 0 : i32
    %c0_i32_1 = arith.constant 0 : i32
    return %arg0, %c0_i32, %c0_i32_0 : i32, i32, i32
  }
}

</mosaic_0001>

<bundles_post_ra>
// kernel: tpu_custom_call.1
= control target key start
LH: loop header
LB: loop body
LE: loop exit
PB: predicated region body
PF: predicated region fallthrough
CT: control target
= control target key end

     0   :  { %9 = vsyncpa [#allocation3], 0  ;;  %s4753_s0 = inlined_call_operand.vmem [shape: bf16[2,18,18,128], index: 0, kind: input, shape index: {}]   ;;  %s4754_s1 = inlined_call_operand.vmem [shape: bf16[1152,128], index: 1, kind: input, shape index: {}]   ;;  %s4755_s2 = inlined_call_operand.hbm [shape: bf16[2,256,128], index: 2, kind: output, shape index: {0}]   ;;  %s4756_s3 = inlined_call_operand.hbm [shape: f32[2,2,128], index: 3, kind: output, shape index: {1}]  }
   0x1   :  { %11 = vsyncpa [#allocation3 + $0x1], 0 }
   0x2   :  { %12 = vsyncpa [#allocation5], 0 }
   0x3   :  { %14 = vsyncpa [#allocation5 + $0x1], 0  ;;  %s3529_s12 = smov 0   ;;  %s3531_s13 = smov 0  }
   0x4   :  { %s3533_s14 = smov 0   ;;  %s3535_s15 = smov 0  }
   0x5 LB: > { %s3550_s16 = sadd.s32 4294967295, %s3505_s15   ;;  %s2748_s17 = sadd.s32 4294967294, %s3505_s15   ;;  %s3505_s15 = sphi %s3535_s15, %s4848_s15   ;;  %s3501_s14 = sphi %s3533_s14, %s4847_s14   ;;  %s3497_s13 = sphi %s3531_s13, %s4846_s13   ;;  %s3493_s12 = sphi %s3529_s12, %s4845_s12  }
   0x6   : > { %s3554_s18 = sadd.s32 1, %s3505_s15   ;;  %s74_s19 = sadd.s32 1, %s3501_s14 }
   0x7   : > { %s71_s20 = ssub.s32 %s3505_s15, %s3554_s18  ;;  %p84_p0 = scmp.ne.s32.totalorder %s3501_s14, %s3497_s13 }
   0x8   : > { %p72_p1 = scmp.eq.s32.totalorder %s71_s20, 0  ;;  %p85_p2 = scmp.eq.s32.totalorder %s3550_s16, 1 }
   0x9   : > { %p90_p3 = scmp.ne.s32.totalorder %s3497_s13, %s3493_s12  ;;  %p91_p4 = scmp.eq.s32.totalorder %s2748_s17, 1 }
   0xa   : > { %s3565_s21 = scalar_select %p72_p1, %s3501_s14, %s74_s19  }
   0xb   : > { %p3567_p5 = por %p85_p2, %p84_p0  ;;  %p3571_p6 = por %p91_p4, %p90_p3 }
   0xc   : > { %p2751_p7 = scmp.ge.s32.totalorder %s3505_s15, 1  ;;  %p146_p8 = scmp.lt.s32.totalorder %s3505_s15, 3 }
   0xe   : > { %p147_p9 = pnand %p2751_p7, %p146_p8 }
  0x10   : > { %150 = sbr.rel (%p147_p9) target bundleno = 780 (0x30c), region = 28 }
  0x15   : > { %v3165_v0 = vld [vmem:[%s4754_s1 + $0x38] sm:$0xff]  ;;  %v3164_v1 = vld [vmem:[%s4754_s1 + $0x30] sm:$0xff]  ;;  %v3163_v2 = vld [vmem:[%s4754_s1 + $0x28] sm:$0xff]  ;;  %p175_p10 = scmp.lt.s32.totalorder %s3550_s16, 1  ;;  %vm234_vm0 = vsmask.f32 3328 }
  0x16   : > { %3326 = vmatpush.bf16.msra.mxu1 %v3165_v0  ;;  %3327 = vmatpush.bf16.msra.mxu2 %v3165_v0  ;;  %v3162_v3 = vld [vmem:[%s4754_s1 + $0x20] sm:$0xff]  ;;  %v3161_v4 = vld [vmem:[%s4754_s1 + $0x18] sm:$0xff]  ;;  %v3160_v5 = vld [vmem:[%s4754_s1 + $0x10] sm:$0xff]  ;;  %vm235_vm1 = vsmask.f32 7440  ;;  %vm669_vm2 = vcmask 1042432  }
  0x17   : > { %3328 = vmatpush.bf16.msra.mxu3 %v3165_v0  ;;  %1644 = vmatpush.bf16.msra.mxu0 %v3165_v0  ;;  %s176_s9 = scalar_select %p175_p10, %s3550_s16, 1  ;;  %v3159_v6 = vld [vmem:[%s4754_s1 + $0x8] sm:$0xff]  ;;  %v3158_v7 = vld [vmem:[%s4754_s1] sm:$0xff]  ;;  %v3181_v8 = vld [vmem:[%s4754_s1 + $0xb8] sm:$0xff]  ;;  %vm670_vm3 = vcmask 1046532  }
  0x18   : > { %v3189_v9 = vld [vmem:[%s4754_s1 + $0xf8] sm:$0xff]  ;;  %v3180_v16 = vld [vmem:[%s4754_s1 + $0xb0] sm:$0xff]  ;;  %v3179_v20 = vld [vmem:[%s4754_s1 + $0xa8] sm:$0xff]  ;;  %s3431_s5 = scalar_lea.hbm %s4755_s2, 256 }
  0x19   : > { %s3350_s17 = smul.u32 216, %s176_s9  ;;  %v3173_v14 = vld [vmem:[%s4754_s1 + $0x78] sm:$0xff]  ;;  %v3188_v17 = vld [vmem:[%s4754_s1 + $0xf0] sm:$0xff]  ;;  %v3187_v21 = vld [vmem:[%s4754_s1 + $0xe8] sm:$0xff]  ;;  %s4601_s9 = sand.u32 1, %s3497_s13  }
  0x1a   : > { %3329 = vmatpush.bf16.msra.mxu1 %v3164_v1  ;;  %3330 = vmatpush.bf16.msra.mxu2 %v3164_v1  ;;  %v3197_v15 = vld [vmem:[%s4754_s1 + $0x138] sm:$0xff]  ;;  %v3172_v18 = vld [vmem:[%s4754_s1 + $0x70] sm:$0xff]  ;;  %v3171_v22 = vld [vmem:[%s4754_s1 + $0x68] sm:$0xff]  ;;  %s2752_s10 = sshll.u32 %s4601_s9, 7  ;;  %s2619_s27 = scalar_lea.sflag [#allocation3], %s4601_s9 }
  0x1b   : > { %3331 = vmatpush.bf16.msra.mxu3 %v3164_v1  ;;  %1645 = vmatpush.bf16.msra.mxu0 %v3164_v1  ;;  %s3606_s26 = scalar_lea.vmem %s4753_s0, %s3350_s17  ;;  %v3196_v19 = vld [vmem:[%s4754_s1 + $0x130] sm:$0xff]  ;;  %v3195_v23 = vld [vmem:[%s4754_s1 + $0x128] sm:$0xff]  ;;  %v3178_v24 = vld [vmem:[%s4754_s1 + $0xa0] sm:$0xff]  ;;  %s4609_s11 = scalar_lea.vmem [#allocation2], %s2752_s10 }
  0x1c   : > { %v3615_v10 = vld [vmem:[%s3606_s26 + $0x30] sm:$0xff]  ;;  %v3618_v11 = vld [vmem:[%s3606_s26 + $0x60] sm:$0xff]  ;;  %v3177_v28 = vld [vmem:[%s4754_s1 + $0x98] sm:$0xff]  ;;  %s2636_s24 = sshll.u32 %s4609_s11, 4  ;;  %s2637_s24 = int_to_ptr.vmem [resolvable:$true] %s2636_s24 }
  0x1d   : > { %v3152_v12 = vld [vmem:[%s3606_s26 + $0x90] sm:$0xff]  ;;  %v3140_v13 = vld [vmem:[%s3606_s26] sm:$0xff]  ;;  %v3185_v29 = vld [vmem:[%s4754_s1 + $0xd8] sm:$0xff] }
  0x1e   : > { %3332 = vmatpush.bf16.msra.mxu1 %v3163_v2  ;;  %3333 = vmatpush.bf16.msra.mxu2 %v3163_v2  ;;  %v3186_v25 = vld [vmem:[%s4754_s1 + $0xe0] sm:$0xff]  ;;  %v3676_v31 = vld [vmem:[%s3606_s26 + $0x6c] sm:$0xff]  ;;  %v3169_v34 = vld [vmem:[%s4754_s1 + $0x58] sm:$0xff] }
  0x1f   : > { %3334 = vmatpush.bf16.msra.mxu3 %v3163_v2  ;;  %1646 = vmatpush.bf16.msra.mxu0 %v3163_v2  ;;  %v3170_v26 = vld [vmem:[%s4754_s1 + $0x60] sm:$0xff]  ;;  %v3680_v33 = vld [vmem:[%s3606_s26 + $0xc] sm:$0xff]  ;;  %v3193_v35 = vld [vmem:[%s4754_s1 + $0x118] sm:$0xff] }
  0x20   : > { %v3194_v27 = vld [vmem:[%s4754_s1 + $0x120] sm:$0xff]  ;;  %v3176_v36 = vld [vmem:[%s4754_s1 + $0x90] sm:$0xff]  ;;  %v3175_v40 = vld [vmem:[%s4754_s1 + $0x88] sm:$0xff] }
  0x21   : > { %v3673_v30 = vld [vmem:[%s3606_s26 + $0x3c] sm:$0xff]  ;;  %v3184_v37 = vld [vmem:[%s4754_s1 + $0xd0] sm:$0xff]  ;;  %v3183_v41 = vld [vmem:[%s4754_s1 + $0xc8] sm:$0xff] }
  0x22   : > { %3335 = vmatpush.bf16.msra.mxu1 %v3162_v3  ;;  %3336 = vmatpush.bf16.msra.mxu2 %v3162_v3  ;;  %v3153_v32 = vld [vmem:[%s3606_s26 + $0x9c] sm:$0xff]  ;;  %v3168_v38 = vld [vmem:[%s4754_s1 + $0x50] sm:$0xff]  ;;  %v3167_v42 = vld [vmem:[%s4754_s1 + $0x48] sm:$0xff] }
  0x23   : > { %3337 = vmatpush.bf16.msra.mxu3 %v3162_v3  ;;  %1647 = vmatpush.bf16.msra.mxu0 %v3162_v3  ;;  %v3192_v39 = vld [vmem:[%s4754_s1 + $0x110] sm:$0xff]  ;;  %v3191_v43 = vld [vmem:[%s4754_s1 + $0x108] sm:$0xff]  ;;  %v3174_v44 = vld [vmem:[%s4754_s1 + $0x80] sm:$0xff] }
  0x24   : > { %v3182_v45 = vld [vmem:[%s4754_s1 + $0xc0] sm:$0xff]  ;;  %v3728_v48 = vld [vmem:[%s3606_s26 + $0x48] sm:$0xff]  ;;  %v3150_v49 = vld [vmem:[%s3606_s26 + $0x78] sm:$0xff] }
  0x25   : > { %v3166_v46 = vld [vmem:[%s4754_s1 + $0x40] sm:$0xff]  ;;  %v3154_v50 = vld [vmem:[%s3606_s26 + $0xa8] sm:$0xff]  ;;  %v3733_v51 = vld [vmem:[%s3606_s26 + $0x18] sm:$0xff] }
  0x26   : > { %3338 = vmatpush.bf16.msra.mxu1 %v3161_v4  ;;  %3339 = vmatpush.bf16.msra.mxu2 %v3161_v4  ;;  %v3190_v47 = vld [vmem:[%s4754_s1 + $0x100] sm:$0xff]  ;;  %v3213_v54 = vld [vmem:[%s4754_s1 + $0x1b8] sm:$0xff]  ;;  %v3760_v62 = vld [vmem:[%s3606_s26 + $0xc] sm:$0xf] }
  0x27   : > { %3340 = vmatpush.bf16.msra.mxu3 %v3161_v4  ;;  %1648 = vmatpush.bf16.msra.mxu0 %v3161_v4  ;;  %v3736_v52 = vld [vmem:[%s3606_s26] sm:$0xf]  ;;  %v3740_v53 = vld [vmem:[%s3606_s26 + $0x4] sm:$0xf]  ;;  %v3221_v55 = vld [vmem:[%s4754_s1 + $0x1f8] sm:$0xff]  ;;  %v262_v1 = vshrl.u32 %v3760_v62, 16 }
  0x28   : > { %v3205_v56 = vld [vmem:[%s4754_s1 + $0x178] sm:$0xff]  ;;  %v238_v57 = vshrl.u32 %v3736_v52, 16  ;;  %v241_v58 = vshll.u32 %v3736_v52, 16  ;;  %v247_v60 = vshll.u32 %v3740_v53, 16  ;;  %v251_v61 = vshrl.u32 %v3740_v53, 16  ;;  %vm3784_vm4 = vmor %vm234_vm0, %vm235_vm1 }
  0x29   : > { %v3229_v59 = vld [vmem:[%s4754_s1 + $0x238] sm:$0xff]  ;;  %v3763_v63 = vld [vmem:[%s3606_s26 + $0x10] sm:$0xf]  ;;  %v182_v0 = vld [vmem:[%s3606_s26 + $0x8] sm:$0x1]  ;;  %v265_v2 = vshll.u32 %v3760_v62, 16 }
  0x2a   : > { %3341 = vmatpush.bf16.msra.mxu1 %v3160_v5  ;;  %3342 = vmatpush.bf16.msra.mxu2 %v3160_v5  ;;  %v271_v3 = vshll.u32 %v3763_v63, 16  ;;  %v275_v4 = vshrl.u32 %v3763_v63, 16  ;;  %vm3789_vm5 = vmor %vm669_vm2, %vm670_vm3 }
  0x2b   : > { %3343 = vmatpush.bf16.msra.mxu3 %v3160_v5  ;;  %1649 = vmatpush.bf16.msra.mxu0 %v3160_v5  ;;  %v240_v5 = vrot.slane %v238_v57, 4 }
  0x2e   : > { %3344 = vmatpush.bf16.msra.mxu1 %v3159_v6  ;;  %3345 = vmatpush.bf16.msra.mxu2 %v3159_v6 }
  0x2f   : > { %3346 = vmatpush.bf16.msra.mxu3 %v3159_v6  ;;  %1650 = vmatpush.bf16.msra.mxu0 %v3159_v6  ;;  %v243_v6 = vrot.slane %v241_v58, 5 }
  0x32   : > { %3347 = vmatpush.bf16.msra.mxu1 %v3158_v7  ;;  %3348 = vmatpush.bf16.msra.mxu2 %v3158_v7 }
  0x33   : > { %3349 = vmatpush.bf16.msra.mxu3 %v3158_v7  ;;  %1651 = vmatpush.bf16.msra.mxu0 %v3158_v7  ;;  %v249_v7 = vrot.slane %v247_v60, 5 }
  0x35   : > { %1672 = vmatmul.bf16.vlgmr.msra.gmra.mxu1 %v3615_v10  ;;  %1692 = vmatmul.bf16.vlgmr.msra.gmra.mxu2 %v3618_v11 }
  0x36   : > { %1822 = vmatpush.bf16.msrb.mxu2 %v3181_v8  ;;  %1712 = vmatmul.bf16.vlgmr.msra.gmra.mxu3 %v3152_v12  ;;  %v253_v8 = vrot.slane %v251_v61, 4  ;;  %v264_v12 = vrot.slane %v262_v1, 4 }
  0x37   : > { %1911 = vmatpush.bf16.msrb.mxu3 %v3189_v9  ;;  %1652 = vmatmul.bf16.vlgmr.msra.gmra.mxu0 %v3140_v13  ;;  %v257_v9 = vshll.u32 %v182_v0, 16  ;;  %v267_v13 = vrot.slane %v265_v2, 5 }
  0x38   : > { %1733 = vmatpush.bf16.msrb.mxu1 %v3173_v14  ;;  %2000 = vmatpush.bf16.msrb.mxu0 %v3197_v15  ;;  %v273_v14 = vrot.slane %v271_v3, 5  ;;  %v277_v15 = vrot.slane %v275_v4, 4  ;;  %v3817_v3 = vld [vmem:[%s3606_s26 + $0x20] sm:$0x1] }
  0x3a   : > { %1823 = vmatpush.bf16.msrb.mxu2 %v3180_v16  ;;  %v244_v16 = vor.u32 %v243_v6, %v240_v5  ;;  %v681_v5 = vrot.slane %v3763_v63, 5  ;;  %v3212_v63 = vld [vmem:[%s4754_s1 + $0x1b0] sm:$0xff] }
  0x3b   : > { %1912 = vmatpush.bf16.msrb.mxu3 %v3188_v17  ;;  %v254_v17 = vor.u32 %v253_v8, %v249_v7 }
  0x3c   : > { %1734 = vmatpush.bf16.msrb.mxu1 %v3172_v18  ;;  %2001 = vmatpush.bf16.msrb.mxu0 %v3196_v19  ;;  %v674_v18 = vrot.slane %v3740_v53, 5  ;;  %v3772_v19 = vld [vmem:[%s3606_s26 + $0x14] sm:$0x1] }
  0x3e   : > { %1824 = vmatpush.bf16.msrb.mxu2 %v3179_v20  ;;  %v3775_v20 = vld [vmem:[%s3606_s26 + $0x54] sm:$0xff] }
  0x3f   : > { %1913 = vmatpush.bf16.msrb.mxu3 %v3187_v21  ;;  %v3151_v21 = vld [vmem:[%s3606_s26 + $0x84] sm:$0xff] }
  0x40   : > { %1735 = vmatpush.bf16.msrb.mxu1 %v3171_v22  ;;  %2002 = vmatpush.bf16.msrb.mxu0 %v3195_v23  ;;  %v3155_v22 = vld [vmem:[%s3606_s26 + $0xb4] sm:$0xff]  ;;  %v3780_v23 = vld [vmem:[%s3606_s26 + $0x24] sm:$0xff] }
  0x42   : > { %1825 = vmatpush.bf16.msrb.mxu2 %v3178_v24  ;;  %v259_v24 = vrot.slane %v257_v9, 5  ;;  %v305_v9 = vshll.u32 %v3817_v3, 16 }
  0x43   : > { %1914 = vmatpush.bf16.msrb.mxu3 %v3186_v25  ;;  %v2755_v25 = vrot.slane %v3736_v52, 9 }
  0x44   : > { %1736 = vmatpush.bf16.msrb.mxu1 %v3170_v26  ;;  %2003 = vmatpush.bf16.msrb.mxu0 %v3194_v27  ;;  %v268_v26 = vor.u32 %v267_v13, %v264_v12  ;;  %v278_v27 = vor.u32 %v277_v15, %v273_v14  ;;  %v2756_v13 = vrot.slane %v3760_v62, 9  ;;  %v684_v15 = vrot.slane %v3772_v19, 5  ;;  %v3204_v62 = vld [vmem:[%s4754_s1 + $0x170] sm:$0xff] }
  0x45   : > { %1677 = vmatmul.bf16.gmra.mxu1 %v3673_v30  ;;  %1697 = vmatmul.bf16.gmra.mxu2 %v3676_v31 }
  0x46   : > { %1826 = vmatpush.bf16.msrb.mxu2 %v3177_v28  ;;  %1717 = vmatmul.bf16.gmra.mxu3 %v3153_v32  ;;  %v281_v28 = vshll.u32 %v3772_v19, 16  ;;  %v245_v32 = vrot.slane %v244_v16, 4  ;;  %v3837_v19 = vld [vmem:[%s3606_s26 + $0x28] sm:$0xf] }
  0x47   : > { %1915 = vmatpush.bf16.msrb.mxu3 %v3185_v29  ;;  %1657 = vmatmul.bf16.gmra.mxu0 %v3680_v33 }
  0x48   : > { %1737 = vmatpush.bf16.msrb.mxu1 %v3169_v34  ;;  %2004 = vmatpush.bf16.msrb.mxu0 %v3193_v35  ;;  %v255_v34 = vrot.slane %v254_v17, 4  ;;  %v676_v35 = vrot.slane %v674_v18, 4 }
  0x4a   : > { %1827 = vmatpush.bf16.msrb.mxu2 %v3176_v36  ;;  %v677_v36 = vrot.slane %v182_v0, 5 }
  0x4b   : > { %1916 = vmatpush.bf16.msrb.mxu3 %v3184_v37 }
  0x4c   : > { %1738 = vmatpush.bf16.msrb.mxu1 %v3168_v38  ;;  %2005 = vmatpush.bf16.msrb.mxu0 %v3192_v39  ;;  %v3795_v38 = vld [vmem:[%s3606_s26 + $0x18] sm:$0xf]  ;;  %v3798_v39 = vld [vmem:[%s3606_s26 + $0x1c] sm:$0xf] }
  0x4d   : > { %v299_v52 = vshrl.u32 %v3798_v39, 16 }
  0x4e   : > { %1828 = vmatpush.bf16.msrb.mxu2 %v3175_v40  ;;  %v269_v40 = vrot.slane %v268_v26, 4 }
  0x4f   : > { %1917 = vmatpush.bf16.msrb.mxu3 %v3183_v41  ;;  %v279_v41 = vrot.slane %v278_v27, 4  ;;  %v301_v0 = vrot.slane %v299_v52, 4 }
  0x50   : > { %1739 = vmatpush.bf16.msrb.mxu1 %v3167_v42  ;;  %2006 = vmatpush.bf16.msrb.mxu0 %v3191_v43  ;;  %v283_v42 = vrot.slane %v281_v28, 5  ;;  %v250_v43 = vsel %vm3784_vm4, %v245_v32, %v249_v7  ;;  %v274_v53 = vsel %vm3784_vm4, %v269_v40, %v273_v14  ;;  %v683_v14 = vrot.slane %v681_v5, 4 }
  0x51   : > { %v918_v1 = vunpack.c.l.b16 %v274_v53 }
  0x52   : > { %1829 = vmatpush.bf16.msrb.mxu2 %v3174_v44  ;;  %v260_v44 = vsel %vm3784_vm4, %v255_v34, %v259_v24  ;;  %v682_v24 = vsel %vm3789_vm5, %v2756_v13, %v681_v5  ;;  %v319_v34 = vshll.u32 %v3837_v19, 16 }
  0x53   : > { %1918 = vmatpush.bf16.msrb.mxu3 %v3182_v45  ;;  %v675_v45 = vsel %vm3789_vm5, %v2755_v25, %v674_v18  ;;  %v307_v18 = vrot.slane %v305_v9, 5  ;;  %v685_v25 = vsel %vm3789_vm5, %v683_v14, %v684_v15 }
  0x54   : > { %1740 = vmatpush.bf16.msrb.mxu1 %v3166_v46  ;;  %2007 = vmatpush.bf16.msrb.mxu0 %v3190_v47  ;;  %v678_v46 = vsel %vm3789_vm5, %v676_v35, %v677_v36  ;;  %v286_v47 = vshrl.u32 %v3795_v38, 16  ;;  %v980_v57 = vunpack.c.l.b16 %v675_v45  ;;  %v323_v35 = vshrl.u32 %v3837_v19, 16 }
  0x55   : > { %1682 = vmatmul.bf16.gmra.mxu1 %v3728_v48  ;;  %1702 = vmatmul.bf16.gmra.mxu2 %v3150_v49  ;;  %v289_v49 = vshll.u32 %v3795_v38, 16  ;;  %v981_v58 = vunpack.c.l.b16 %v678_v46  ;;  %v982_v36 = vunpack.c.l.b16 %v682_v24  ;;  %v983_v40 = vunpack.c.l.b16 %v685_v25 }
  0x56   : > { %1722 = vmatmul.bf16.gmra.mxu3 %v3154_v50  ;;  %2178 = vmatpush.bf16.msra.mxu2 %v3213_v54  ;;  %v295_v50 = vshll.u32 %v3798_v39, 16  ;;  %v284_v54 = vsel %vm3784_vm4, %v279_v41, %v283_v42  ;;  %v321_v45 = vrot.slane %v319_v34, 5  ;;  %v325_v46 = vrot.slane %v323_v35, 4 }
  0x57   : > { %1662 = vmatmul.bf16.gmra.mxu0 %v3733_v51  ;;  %2267 = vmatpush.bf16.msra.mxu3 %v3221_v55  ;;  %v916_v55 = vunpack.c.l.b16 %v250_v43  ;;  %v291_v60 = vrot.slane %v289_v49, 5  ;;  %v919_v2 = vunpack.c.l.b16 %v284_v54  ;;  %v1012_v6 = vpack.c.b16 %v981_v58, %v980_v57 }
  0x58   : > { %2089 = vmatpush.bf16.msra.mxu1 %v3205_v56  ;;  %2356 = vmatpush.bf16.msra.mxu0 %v3229_v59  ;;  %v917_v56 = vunpack.c.l.b16 %v260_v44  ;;  %v288_v59 = vrot.slane %v286_v47, 4  ;;  %v297_v61 = vrot.slane %v295_v50, 5  ;;  %v191_v47 = vld [vmem:[%s3606_s26 + $0x2c] sm:$0x1]  ;;  %v3855_v49 = vpack.c.b16 %v983_v40, %v982_v36 }
  0x59   : > { %v949_v12 = vpack.c.b16 %v919_v2, %v918_v1  ;;  %v688_v50 = vrot.slane %v3798_v39, 5  ;;  %v326_v54 = vor.u32 %v325_v46, %v321_v45  ;;  %v691_v58 = vrot.slane %v3817_v3, 5 }
  0x5a   : > { %v948_v4 = vpack.c.b16 %v917_v56, %v916_v55  ;;  %v292_v7 = vor.u32 %v291_v60, %v288_v59  ;;  %v302_v8 = vor.u32 %v301_v0, %v297_v61  ;;  %2179 = vmatpush.bf16.msra.mxu2 %v3212_v63  ;;  %v329_v55 = vshll.u32 %v191_v47, 16  ;;  %v3869_v0 = vld [vmem:[%s3606_s26 + $0x34] sm:$0xf] }
  0x5b   : > { %v2757_v56 = vrot.slane %v3795_v38, 9  ;;  %v690_v57 = vrot.slane %v688_v50, 4  ;;  %v327_v39 = vrot.slane %v326_v54, 4  ;;  %v343_v5 = vshll.u32 %v3869_v0, 16 }
  0x5c   : > { %v293_v16 = vrot.slane %v292_v7, 4  ;;  %v303_v17 = vrot.slane %v302_v8, 4  ;;  %2090 = vmatpush.bf16.msra.mxu1 %v3204_v62  ;;  %v331_v60 = vrot.slane %v329_v55, 5 }
  0x5d   : > { %v689_v1 = vsel %vm3789_vm5, %v2757_v56, %v688_v50  ;;  %v692_v38 = vsel %vm3789_vm5, %v690_v57, %v691_v58  ;;  %v345_v15 = vrot.slane %v343_v5, 5  ;;  %v3227_v50 = vld [vmem:[%s4754_s1 + $0x228] sm:$0xff] }
  0x5e   : > { %v298_v26 = vsel %vm3784_vm4, %v293_v16, %v297_v61  ;;  %v308_v27 = vsel %vm3784_vm4, %v303_v17, %v307_v18  ;;  %v3866_v61 = vld [vmem:[%s3606_s26 + $0x30] sm:$0xf]  ;;  %v332_v2 = vsel %vm3784_vm4, %v327_v39, %v331_v60  ;;  %v984_v7 = vunpack.c.l.b16 %v689_v1  ;;  %v3885_v18 = vld [vmem:[%s3606_s26 + $0x38] sm:$0x1]  ;;  %v3928_v60 = vld [vmem:[%s3606_s26 + $0x44] sm:$0x1] }
  0x5f   : > { %v920_v41 = vunpack.c.l.b16 %v298_v26  ;;  %v921_v42 = vunpack.c.l.b16 %v308_v27  ;;  %v334_v3 = vshrl.u32 %v3866_v61, 16  ;;  %v985_v8 = vunpack.c.l.b16 %v692_v38 }
  0x60   : > { %v695_v17 = vrot.slane %v3837_v19, 5  ;;  %v353_v24 = vshll.u32 %v3885_v18, 16  ;;  %v698_v27 = vrot.slane %v191_v47, 5  ;;  %v3896_v19 = vld [vmem:[%s3606_s26 + $0x3c] sm:$0xf]  ;;  %v702_v1 = vrot.slane %v3869_v0, 5 }
  0x61   : > { %v3858_v52 = vpack.c.b16 %v921_v42, %v920_v41  ;;  %v336_v13 = vrot.slane %v334_v3, 4  ;;  %v3887_v63 = vpack.c.b16 %v985_v8, %v984_v7  ;;  %v358_v41 = vshrl.u32 %v3896_v19, 16 }
  0x62   : > { %v697_v26 = vrot.slane %v695_v17, 4  ;;  %v355_v36 = vrot.slane %v353_v24, 5  ;;  %v361_v42 = vshll.u32 %v3896_v19, 16  ;;  %v377_v3 = vshll.u32 %v3928_v60, 16 }
  0x63   : > { %v360_v55 = vrot.slane %v358_v41, 4  ;;  %v2759_v5 = vrot.slane %v3866_v61, 9  ;;  %v705_v7 = vrot.slane %v3885_v18, 5 }
  0x64   : > { %v363_v56 = vrot.slane %v361_v42, 5 }
  0x65   : > { %1687 = vmatmul.bf16.gmra.mxu1 %v3775_v20  ;;  %1707 = vmatmul.bf16.gmra.mxu2 %v3151_v21  ;;  %v3220_v21 = vld [vmem:[%s4754_s1 + $0x1f0] sm:$0xff] }
  0x66   : > { %1727 = vmatmul.bf16.gmra.mxu3 %v3155_v22  ;;  %v3834_v22 = vld [vmem:[%s3606_s26 + $0x24] sm:$0xf] }
  0x67   : > { %1667 = vmatmul.bf16.gmra.mxu0 %v3780_v23  ;;  %2268 = vmatpush.bf16.msra.mxu3 %v3220_v21  ;;  %v310_v28 = vshrl.u32 %v3834_v22, 16  ;;  %v313_v32 = vshll.u32 %v3834_v22, 16  ;;  %v2758_v25 = vrot.slane %v3834_v22, 9  ;;  %v3219_v22 = vld [vmem:[%s4754_s1 + $0x1e8] sm:$0xff] }
  0x69   : > { %v312_v43 = vrot.slane %v310_v28, 4  ;;  %v315_v44 = vrot.slane %v313_v32, 5  ;;  %v3211_v28 = vld [vmem:[%s4754_s1 + $0x1a8] sm:$0xff]  ;;  %v3904_v32 = vld [vmem:[%s3606_s26 + $0x40] sm:$0xf]  ;;  %v696_v40 = vsel %vm3789_vm5, %v2758_v25, %v695_v17 }
  0x6a   : > { %2180 = vmatpush.bf16.msra.mxu2 %v3211_v28 }
  0x6b   : > { %v316_v53 = vor.u32 %v315_v44, %v312_v43  ;;  %2269 = vmatpush.bf16.msra.mxu3 %v3219_v22  ;;  %v367_v43 = vshll.u32 %v3904_v32, 16  ;;  %v371_v44 = vshrl.u32 %v3904_v32, 16 }
  0x6d   : > { %v317_v59 = vrot.slane %v316_v53, 4  ;;  %v986_v53 = vunpack.c.l.b16 %v696_v40  ;;  %v369_v57 = vrot.slane %v367_v43, 5  ;;  %v373_v58 = vrot.slane %v371_v44, 4 }
  0x6e   : > { %v709_v40 = vrot.slane %v3904_v32, 5  ;;  %v712_v32 = vrot.slane %v3928_v60, 5 }
  0x75   : > { %1741 = vmatmul.bf16.vlgmr.msrb.gmra.mxu1 %v948_v4  ;;  %1830 = vmatmul.bf16.vlgmr.msrb.gmra.mxu2 %v1012_v6  ;;  %v337_v4 = vshll.u32 %v3866_v61, 16  ;;  %v347_v6 = vshrl.u32 %v3869_v0, 16  ;;  %v703_v61 = vsel %vm3789_vm5, %v2759_v5, %v702_v1 }
  0x76   : > { %1919 = vmatmul.bf16.vlgmr.msrb.gmra.mxu3 %v3680_v33  ;;  %v3228_v33 = vld [vmem:[%s4754_s1 + $0x230] sm:$0xff] }
  0x77   : > { %2008 = vmatmul.bf16.vlgmr.msrb.gmra.mxu0 %v949_v12  ;;  %v339_v14 = vrot.slane %v337_v4, 5  ;;  %v349_v16 = vrot.slane %v347_v6, 4  ;;  %v704_v6 = vrot.slane %v702_v1, 4 }
  0x78   : > { %2357 = vmatpush.bf16.msra.mxu0 %v3228_v33 }
  0x79   : > { %v340_v62 = vor.u32 %v339_v14, %v336_v13  ;;  %v350_v33 = vor.u32 %v349_v16, %v345_v15  ;;  %v3946_v13 = vld [vmem:[%s3606_s26 + $0x4c] sm:$0xf]  ;;  %v706_v14 = vsel %vm3789_vm5, %v704_v6, %v705_v7 }
  0x7a   : > { %v391_v18 = vshll.u32 %v3946_v13, 16  ;;  %v989_v24 = vunpack.c.l.b16 %v706_v14 }
  0x7b   : > { %v341_v34 = vrot.slane %v340_v62, 4  ;;  %v351_v35 = vrot.slane %v350_v33, 4  ;;  %v395_v62 = vshrl.u32 %v3946_v13, 16  ;;  %v988_v33 = vunpack.c.l.b16 %v703_v61 }
  0x7c   : > { %2358 = vmatpush.bf16.msra.mxu0 %v3227_v50  ;;  %v393_v22 = vrot.slane %v391_v18, 5 }
  0x7d   : > { %v346_v46 = vsel %vm3784_vm4, %v341_v34, %v345_v15  ;;  %v356_v47 = vsel %vm3784_vm4, %v351_v35, %v355_v36  ;;  %v397_v34 = vrot.slane %v395_v62, 4  ;;  %v3961_v35 = vld [vmem:[%s3606_s26 + $0x50] sm:$0x1]  ;;  %v3963_v36 = vpack.c.b16 %v989_v24, %v988_v33  ;;  %v4021_v24 = vld [vmem:[%s3606_s26 + $0x5c] sm:$0x1] }
  0x7e   : > { %v925_v39 = vunpack.c.l.b16 %v356_v47  ;;  %v401_v44 = vshll.u32 %v3961_v35, 16  ;;  %v711_v47 = vrot.slane %v709_v40, 4  ;;  %v716_v33 = vrot.slane %v3946_v13, 5 }
  0x7f   : > { %v398_v43 = vor.u32 %v397_v34, %v393_v22 }
  0x80   : > { %v713_v1 = vsel %vm3789_vm5, %v711_v47, %v712_v32  ;;  %v4044_v47 = vld [vmem:[%s3606_s26 + $0x64] sm:$0xf] }
  0x81   : > { %v991_v61 = vunpack.c.l.b16 %v713_v1 }
  0x85   : > { %1746 = vmatmul.bf16.gmra.mxu1 %v949_v12  ;;  %1835 = vmatmul.bf16.gmra.mxu2 %v3855_v49  ;;  %v923_v12 = vunpack.c.l.b16 %v332_v2  ;;  %v374_v2 = vor.u32 %v373_v58, %v369_v57 }
  0x86   : > { %1924 = vmatmul.bf16.gmra.mxu3 %v3733_v51  ;;  %v322_v51 = vsel %vm3784_vm4, %v317_v59, %v321_v45  ;;  %v3203_v45 = vld [vmem:[%s4754_s1 + $0x168] sm:$0xff]  ;;  %v924_v59 = vunpack.c.l.b16 %v346_v46  ;;  %v2760_v46 = vrot.slane %v3896_v19, 9  ;;  %v3988_v19 = vld [vmem:[%s3606_s26 + $0x54] sm:$0xf] }
  0x87   : > { %2013 = vmatmul.bf16.gmra.mxu0 %v3858_v52  ;;  %v922_v9 = vunpack.c.l.b16 %v322_v51  ;;  %2091 = vmatpush.bf16.msra.mxu1 %v3203_v45  ;;  %v364_v51 = vor.u32 %v363_v56, %v360_v55  ;;  %v375_v8 = vrot.slane %v374_v2, 4  ;;  %v3210_v55 = vld [vmem:[%s4754_s1 + $0x1a0] sm:$0xff]  ;;  %v406_v5 = vshrl.u32 %v3988_v19, 16 }
  0x88   : > { %v3934_v4 = vpack.c.b16 %v925_v39, %v924_v59  ;;  %v3218_v56 = vld [vmem:[%s4754_s1 + $0x1e0] sm:$0xff]  ;;  %2181 = vmatpush.bf16.msra.mxu2 %v3210_v55  ;;  %v710_v60 = vsel %vm3789_vm5, %v2760_v46, %v709_v40  ;;  %v409_v6 = vshll.u32 %v3988_v19, 16 }
  0x89   : > { %v3889_v21 = vpack.c.b16 %v923_v12, %v922_v9  ;;  %v365_v0 = vrot.slane %v364_v51, 4  ;;  %v379_v9 = vrot.slane %v377_v3, 5  ;;  %v3943_v12 = vld [vmem:[%s3606_s26 + $0x48] sm:$0xf]  ;;  %2270 = vmatpush.bf16.msra.mxu3 %v3218_v56  ;;  %v3202_v59 = vld [vmem:[%s4754_s1 + $0x160] sm:$0xff] }
  0x8a   : > { %v385_v17 = vshll.u32 %v3943_v12, 16  ;;  %v2761_v13 = vrot.slane %v3943_v12, 9  ;;  %v4041_v46 = vld [vmem:[%s3606_s26 + $0x60] sm:$0xf] }
  0x8b   : > { %v370_v15 = vsel %vm3784_vm4, %v365_v0, %v369_v57  ;;  %v380_v16 = vsel %vm3784_vm4, %v375_v8, %v379_v9  ;;  %2092 = vmatpush.bf16.msra.mxu1 %v3202_v59  ;;  %v3226_v8 = vld [vmem:[%s4754_s1 + $0x220] sm:$0xff]  ;;  %v990_v9 = vunpack.c.l.b16 %v710_v60  ;;  %v433_v56 = vshll.u32 %v4041_v46, 16 }
  0x8c   : > { %v926_v25 = vunpack.c.l.b16 %v370_v15  ;;  %v387_v28 = vrot.slane %v385_v17, 5  ;;  %2359 = vmatpush.bf16.msra.mxu0 %v3226_v8  ;;  %v439_v59 = vshll.u32 %v4044_v47, 16  ;;  %v443_v60 = vshrl.u32 %v4044_v47, 16 }
  0x8d   : > { %v435_v8 = vrot.slane %v433_v56, 5  ;;  %v4096_v56 = vld [vmem:[%s3606_s26 + $0x6c] sm:$0xf] }
  0x95   : > { %1751 = vmatmul.bf16.gmra.mxu1 %v3858_v52  ;;  %1840 = vmatmul.bf16.gmra.mxu2 %v3887_v63 }
  0x96   : > { %1929 = vmatmul.bf16.gmra.mxu3 %v3780_v23  ;;  %v699_v23 = vsel %vm3789_vm5, %v697_v26, %v698_v27  ;;  %v927_v26 = vunpack.c.l.b16 %v380_v16  ;;  %v408_v16 = vrot.slane %v406_v5, 4 }
  0x97   : > { %2018 = vmatmul.bf16.gmra.mxu0 %v3889_v21  ;;  %v987_v54 = vunpack.c.l.b16 %v699_v23 }
  0x98   : > { %v3968_v41 = vpack.c.b16 %v927_v26, %v926_v25  ;;  %v4025_v26 = vpack.c.b16 %v991_v61, %v990_v9  ;;  %v441_v9 = vrot.slane %v439_v59, 5  ;;  %v445_v61 = vrot.slane %v443_v60, 4  ;;  %v4099_v59 = vld [vmem:[%s3606_s26 + $0x70] sm:$0xf] }
  0x99   : > { %v3931_v38 = vpack.c.b16 %v987_v54, %v986_v53  ;;  %v399_v53 = vrot.slane %v398_v43, 4  ;;  %v403_v54 = vrot.slane %v401_v44, 5  ;;  %v718_v43 = vrot.slane %v716_v33, 4 }
  0x9a   : > { %4783 = vst [vmem:[#allocation10_spill] sm:$0xff] %v4025_v26  ;;  %v719_v44 = vrot.slane %v3961_v35, 5 }
  0x9b   : > { %v404_v2 = vsel %vm3784_vm4, %v399_v53, %v403_v54 }
  0x9c   : > { %v929_v15 = vunpack.c.l.b16 %v404_v2  ;;  %v720_v35 = vsel %vm3789_vm5, %v718_v43, %v719_v44 }
  0xa5   : > { %1756 = vmatmul.bf16.gmra.mxu1 %v3889_v21  ;;  %1845 = vmatmul.bf16.gmra.mxu2 %v3931_v38 }
  0xa6   : > { %1934 = vmatmul.bf16.gmra.mxu3 %v3615_v10  ;;  %v382_v10 = vshrl.u32 %v3943_v12, 16  ;;  %v717_v12 = vsel %vm3789_vm5, %v2761_v13, %v716_v33 }
  0xa7   : > { %2023 = vmatmul.bf16.gmra.mxu0 %v3934_v4 }
  0xa8   : > { %v384_v27 = vrot.slane %v382_v10, 4  ;;  %v411_v10 = vrot.slane %v409_v6, 5  ;;  %v992_v6 = vunpack.c.l.b16 %v717_v12 }
  0xaa   : > { %v388_v42 = vor.u32 %v387_v28, %v384_v27  ;;  %v412_v34 = vor.u32 %v411_v10, %v408_v16  ;;  %v4067_v16 = vld [vmem:[%s3606_s26 + $0x68] sm:$0x1] }
  0xac   : > { %v389_v50 = vrot.slane %v388_v42, 4  ;;  %v425_v42 = vshll.u32 %v4021_v24, 16  ;;  %v413_v32 = vrot.slane %v412_v34, 4 }
  0xae   : > { %v394_v51 = vsel %vm3784_vm4, %v389_v50, %v393_v22  ;;  %v427_v53 = vrot.slane %v425_v42, 5  ;;  %v449_v42 = vshll.u32 %v4067_v16, 16 }
  0xaf   : > { %v928_v14 = vunpack.c.l.b16 %v394_v51 }
  0xb1   : > { %v4029_v28 = vpack.c.b16 %v929_v15, %v928_v14 }
  0xb2   : > { %v3966_v23 = vpop.f32.mrf.mxu1 }
  0xb3   : > { %4784 = vst [vmem:[#allocation11_spill] sm:$0xff] %v4029_v28 }
  0xb4   : > { %v3971_v45 = vpop.f32.mrf.mxu0 }
  0xb5   : > { %1761 = vmatmul.bf16.gmra.mxu1 %v3934_v4  ;;  %1850 = vmatmul.bf16.gmra.mxu2 %v3963_v36 }
  0xb6   : > { %1939 = vmatmul.bf16.gmra.mxu3 %v3673_v30  ;;  %v3991_v30 = vld [vmem:[%s3606_s26 + $0x58] sm:$0xf] }
  0xb7   : > { %2028 = vmatmul.bf16.gmra.mxu0 %v3968_v41  ;;  %v415_v7 = vshll.u32 %v3991_v30, 16  ;;  %v419_v0 = vshrl.u32 %v3991_v30, 16 }
  0xb8   : > { %v3985_v57 = vpop.f32.mrf.mxu2 }
  0xb9   : > { %v3993_v58 = vpop.f32.mrf.mxu3  ;;  %v417_v17 = vrot.slane %v415_v7, 5  ;;  %v421_v18 = vrot.slane %v419_v0, 4  ;;  %v993_v7 = vunpack.c.l.b16 %v720_v35  ;;  %v451_v35 = vrot.slane %v449_v42, 5 }
  0xba   : > { %4781 = vst [vmem:[#allocation8_spill] sm:$0xff] %v3993_v58  ;;  %v3998_v39 = vpop.f32.mrf.mxu1 }
  0xbb   : > { %v422_v40 = vor.u32 %v421_v18, %v417_v17  ;;  %v418_v2 = vsel %vm3784_vm4, %v413_v32, %v417_v17  ;;  %v723_v18 = vrot.slane %v3991_v30, 5  ;;  %v4074_v17 = vpack.c.b16 %v993_v7, %v992_v6 }
  0xbc   : > { %v4008_v3 = vpop.f32.mrf.mxu0  ;;  %v930_v14 = vunpack.c.l.b16 %v418_v2  ;;  %v2762_v32 = vrot.slane %v3988_v19, 9  ;;  %v726_v30 = vrot.slane %v4021_v24, 5  ;;  %v3217_v19 = vld [vmem:[%s4754_s1 + $0x1d8] sm:$0xff] }
  0xbd   : > { %v423_v50 = vrot.slane %v422_v40, 4  ;;  %4787 = vst [vmem:[#allocation14_spill] sm:$0xff] %v4074_v17  ;;  %v446_v40 = vor.u32 %v445_v61, %v441_v9  ;;  %2271 = vmatpush.bf16.msra.mxu3 %v3217_v19  ;;  %v463_v61 = vshll.u32 %v4099_v59, 16 }
  0xbf   : > { %v428_v5 = vsel %vm3784_vm4, %v423_v50, %v427_v53  ;;  %v725_v50 = vrot.slane %v723_v18, 4  ;;  %v447_v12 = vrot.slane %v446_v40, 4 }
  0xc0   : > { %v4017_v62 = vpop.f32.mrf.mxu2  ;;  %v931_v15 = vunpack.c.l.b16 %v428_v5 }
  0xc1   : > { %v4023_v25 = vpop.f32.mrf.mxu3  ;;  %v727_v2 = vsel %vm3789_vm5, %v725_v50, %v726_v30  ;;  %v452_v6 = vsel %vm3784_vm4, %v447_v12, %v451_v35  ;;  %v4128_v35 = vld [vmem:[%s3606_s26 + $0x74] sm:$0x1] }
  0xc2   : > { %4782 = vst [vmem:[#allocation9_spill] sm:$0xff] %v4023_v25  ;;  %v4027_v27 = vpop.f32.mrf.mxu1  ;;  %v4079_v43 = vpack.c.b16 %v931_v15, %v930_v14  ;;  %v467_v14 = vshrl.u32 %v4099_v59, 16  ;;  %v995_v40 = vunpack.c.l.b16 %v727_v2 }
  0xc4   : > { %v4031_v22 = vpop.f32.mrf.mxu0  ;;  %4788 = vst [vmem:[#allocation15_spill] sm:$0xff] %v4079_v43  ;;  %v469_v12 = vrot.slane %v467_v14, 4 }
  0xc5   : > { %1766 = vmatmul.bf16.gmra.mxu1 %v3968_v41  ;;  %1855 = vmatmul.bf16.gmra.mxu2 %v4025_v26 }
  0xc6   : > { %1944 = vmatmul.bf16.gmra.mxu3 %v3728_v48  ;;  %v430_v48 = vshrl.u32 %v4041_v46, 16 }
  0xc7   : > { %2033 = vmatmul.bf16.gmra.mxu0 %v4029_v28 }
  0xc8   : > { %v4046_v54 = vpop.f32.mrf.mxu2  ;;  %v432_v0 = vrot.slane %v430_v48, 4  ;;  %v3209_v48 = vld [vmem:[%s4754_s1 + $0x198] sm:$0xff] }
  0xc9   : > { %v4052_v55 = vpop.f32.mrf.mxu3  ;;  %2182 = vmatpush.bf16.msra.mxu2 %v3209_v48 }
  0xca   : > { %4785 = vst [vmem:[#allocation12_spill] sm:$0xff] %v4052_v55  ;;  %v4058_v1 = vpop.f32.mrf.mxu1  ;;  %v436_v34 = vor.u32 %v435_v8, %v432_v0  ;;  %v454_v0 = vshrl.u32 %v4096_v56, 16  ;;  %v457_v8 = vshll.u32 %v4096_v56, 16 }
  0xcc   : > { %v4060_v51 = vpop.f32.mrf.mxu0  ;;  %v437_v53 = vrot.slane %v436_v34, 4  ;;  %v456_v50 = vrot.slane %v454_v0, 4  ;;  %v459_v30 = vrot.slane %v457_v8, 5  ;;  %v473_v0 = vshll.u32 %v4128_v35, 16 }
  0xce   : > { %v442_v5 = vsel %vm3784_vm4, %v437_v53, %v441_v9  ;;  %v3201_v9 = vld [vmem:[%s4754_s1 + $0x158] sm:$0xff]  ;;  %v465_v53 = vrot.slane %v463_v61, 5  ;;  %v2763_v61 = vrot.slane %v4041_v46, 9 }
  0xcf   : > { %v932_v42 = vunpack.c.l.b16 %v442_v5  ;;  %2093 = vmatpush.bf16.msra.mxu1 %v3201_v9  ;;  %v460_v5 = vor.u32 %v459_v30, %v456_v50 }
  0xd0   : > { %v4069_v10 = vpop.f32.mrf.mxu2 }
  0xd1   : > { %v4072_v33 = vpop.f32.mrf.mxu3  ;;  %v461_v9 = vrot.slane %v460_v5, 4 }
  0xd2   : > { %4786 = vst [vmem:[#allocation13_spill] sm:$0xff] %v4072_v33  ;;  %v4077_v13 = vpop.f32.mrf.mxu1  ;;  %v730_v33 = vrot.slane %v4044_v47, 5  ;;  %v733_v47 = vrot.slane %v4067_v16, 5 }
  0xd3   : > { %v466_v16 = vsel %vm3784_vm4, %v461_v9, %v465_v53 }
  0xd4   : > { %v4081_v44 = vpop.f32.mrf.mxu0  ;;  %v732_v14 = vrot.slane %v730_v33, 4 }
  0xd5   : > { %1771 = vmatmul.bf16.gmra.mxu1 %v4029_v28  ;;  %1860 = vmatmul.bf16.gmra.mxu2 %v4074_v17 }
  0xd6   : > { %1949 = vmatmul.bf16.gmra.mxu3 %v3775_v20  ;;  %v724_v20 = vsel %vm3789_vm5, %v2762_v32, %v723_v18  ;;  %v3225_v18 = vld [vmem:[%s4754_s1 + $0x218] sm:$0xff]  ;;  %v933_v32 = vunpack.c.l.b16 %v452_v6  ;;  %v470_v6 = vor.u32 %v469_v12, %v465_v53  ;;  %v734_v46 = vsel %vm3789_vm5, %v732_v14, %v733_v47 }
  0xd7   : > { %2038 = vmatmul.bf16.gmra.mxu0 %v4079_v43  ;;  %v994_v34 = vunpack.c.l.b16 %v724_v20  ;;  %v934_v14 = vunpack.c.l.b16 %v466_v16 }
  0xd8   : > { %v4101_v24 = vpop.f32.mrf.mxu2  ;;  %2360 = vmatpush.bf16.msra.mxu0 %v3225_v18  ;;  %v4139_v2 = vpack.c.b16 %v933_v32, %v932_v42  ;;  %v471_v18 = vrot.slane %v470_v6, 4  ;;  %v4153_v42 = vld [vmem:[%s3606_s26 + $0x78] sm:$0xf]  ;;  %v4156_v32 = vld [vmem:[%s3606_s26 + $0x7c] sm:$0xf] }
  0xd9   : > { %v4103_v60 = vpop.f32.mrf.mxu3  ;;  %v478_v6 = vshrl.u32 %v4153_v42, 16 }
  0xda   : > { %4789 = vst [vmem:[#allocation16_spill] sm:$0xff] %v4103_v60  ;;  %v4113_v7 = vpop.f32.mrf.mxu1  ;;  %v4134_v60 = vpack.c.b16 %v995_v40, %v994_v34  ;;  %v475_v34 = vrot.slane %v473_v0, 5  ;;  %v481_v0 = vshll.u32 %v4153_v42, 16 }
  0xdb   : > { %4792 = vst [vmem:[#allocation19_spill] sm:$0xff] %v4139_v2  ;;  %v480_v55 = vrot.slane %v478_v6, 4 }
  0xdc   : > { %v4119_v15 = vpop.f32.mrf.mxu0  ;;  %4791 = vst [vmem:[#allocation18_spill] sm:$0xff] %v4134_v60  ;;  %v476_v12 = vsel %vm3784_vm4, %v471_v18, %v475_v34  ;;  %v483_v53 = vrot.slane %v481_v0, 5  ;;  %v737_v34 = vrot.slane %v4099_v59, 5  ;;  %v2764_v59 = vrot.slane %v4096_v56, 9 }
  0xdd   : > { %v935_v47 = vunpack.c.l.b16 %v476_v12 }
  0xde   : > { %v739_v0 = vrot.slane %v737_v34, 4 }
  0xe0   : > { %v4130_v48 = vpop.f32.mrf.mxu2 }
  0xe1   : > { %v4132_v19 = vpop.f32.mrf.mxu3 }
  0xe2   : > { %4790 = vst [vmem:[#allocation17_spill] sm:$0xff] %v4132_v19  ;;  %v4137_v20 = vpop.f32.mrf.mxu1  ;;  %v997_v19 = vunpack.c.l.b16 %v734_v46 }
  0xe4   : > { %v4142_v8 = vpop.f32.mrf.mxu0 }
  0xe5   : > { %1776 = vmatmul.bf16.gmra.mxu1 %v4079_v43  ;;  %1865 = vmatmul.bf16.gmra.mxu2 %v4134_v60  ;;  %v4180_v43 = vld [vmem:[%s3606_s26 + $0x80] sm:$0x1] }
  0xe6   : > { %1954 = vmatmul.bf16.gmra.mxu3 %v3618_v11  ;;  %v731_v11 = vsel %vm3789_vm5, %v2763_v61, %v730_v33  ;;  %v491_v33 = vshrl.u32 %v4156_v32, 16  ;;  %v497_v6 = vshll.u32 %v4180_v43, 16 }
  0xe7   : > { %2043 = vmatmul.bf16.gmra.mxu0 %v4139_v2  ;;  %v996_v61 = vunpack.c.l.b16 %v731_v11  ;;  %v4186_v11 = vpack.c.b16 %v935_v47, %v934_v14  ;;  %v738_v14 = vsel %vm3789_vm5, %v2764_v59, %v737_v34 }
  0xe8   : > { %v4150_v40 = vpop.f32.mrf.mxu2  ;;  %v493_v60 = vrot.slane %v491_v33, 4  ;;  %v740_v33 = vrot.slane %v4128_v35, 5  ;;  %v499_v35 = vrot.slane %v497_v6, 5 }
  0xe9   : > { %4793 = vst [vmem:[#allocation20_spill] sm:$0xff] %v4150_v40  ;;  %v4158_v50 = vpop.f32.mrf.mxu3  ;;  %v4184_v58 = vpack.c.b16 %v997_v19, %v996_v61  ;;  %v4195_v19 = vld [vmem:[%s3606_s26 + $0x84] sm:$0xf]  ;;  %v744_v40 = vrot.slane %v4156_v32, 5 }
  0xea   : > { %4794 = vst [vmem:[#allocation21_spill] sm:$0xff] %v4158_v50  ;;  %v4160_v30 = vpop.f32.mrf.mxu1  ;;  %v487_v50 = vshll.u32 %v4156_v32, 16  ;;  %v502_v47 = vshrl.u32 %v4195_v19, 16 }
  0xeb   : > { %4797 = vst [vmem:[#allocation24_spill] sm:$0xff] %v4184_v58 }
  0xec   : > { %v4170_v5 = vpop.f32.mrf.mxu0  ;;  %v489_v9 = vrot.slane %v487_v50, 5  ;;  %4798 = vst [vmem:[#allocation25_spill] sm:$0xff] %v4186_v11  ;;  %v484_v50 = vor.u32 %v483_v53, %v480_v55  ;;  %v4203_v55 = vld [vmem:[%s3606_s26 + $0x88] sm:$0xf] }
  0xee   : > { %v494_v12 = vor.u32 %v493_v60, %v489_v9  ;;  %v485_v56 = vrot.slane %v484_v50, 4  ;;  %v515_v50 = vshrl.u32 %v4203_v55, 16 }
  0xf0   : > { %v4176_v18 = vpop.f32.mrf.mxu2  ;;  %v495_v60 = vrot.slane %v494_v12, 4  ;;  %v490_v59 = vsel %vm3784_vm4, %v485_v56, %v489_v9 }
  0xf1   : > { %4795 = vst [vmem:[#allocation22_spill] sm:$0xff] %v4176_v18  ;;  %v4182_v25 = vpop.f32.mrf.mxu3  ;;  %v936_v56 = vunpack.c.l.b16 %v490_v59 }
  0xf2   : > { %4796 = vst [vmem:[#allocation23_spill] sm:$0xff] %v4182_v25  ;;  %v1742_v17 = vpop.f32.mrf.mxu1 }
  0xf3   : > { %v1743_v46 = vadd.f32 %v1742_v17, %v3971_v45  ;;  %v3208_v45 = vld [vmem:[%s4754_s1 + $0x190] sm:$0xff] }
  0xf4   : > { %v2009_v16 = vpop.f32.mrf.mxu0  ;;  %v3216_v17 = vld [vmem:[%s4754_s1 + $0x1d0] sm:$0xff]  ;;  %2183 = vmatpush.bf16.msra.mxu2 %v3208_v45  ;;  %v998_v45 = vunpack.c.l.b16 %v738_v14 }
  0xf5   : > { %1781 = vmatmul.bf16.gmra.mxu1 %v4139_v2  ;;  %1870 = vmatmul.bf16.gmra.mxu2 %v4184_v58  ;;  %v505_v58 = vshll.u32 %v4195_v19, 16  ;;  %v511_v2 = vshll.u32 %v4203_v55, 16 }
  0xf6   : > { %1959 = vmatmul.bf16.gmra.mxu3 %v3676_v31  ;;  %v741_v31 = vsel %vm3789_vm5, %v739_v0, %v740_v33  ;;  %v500_v0 = vsel %vm3784_vm4, %v495_v60, %v499_v35  ;;  %v3224_v33 = vld [vmem:[%s4754_s1 + $0x210] sm:$0xff]  ;;  %v4230_v35 = vld [vmem:[%s3606_s26 + $0x8c] sm:$0x1] }
  0xf7   : > { %2048 = vmatmul.bf16.gmra.mxu0 %v4186_v11  ;;  %2272 = vmatpush.bf16.msra.mxu3 %v3216_v17  ;;  %v504_v17 = vrot.slane %v502_v47, 4  ;;  %v937_v60 = vunpack.c.l.b16 %v500_v0  ;;  %v2765_v0 = vrot.slane %v4153_v42, 9 }
  0xf8   : > { %v1831_v61 = vpop.f32.mrf.mxu2  ;;  %2361 = vmatpush.bf16.msra.mxu0 %v3224_v33 }
  0xf9   : > { %v1832_v53 = vadd.f32 %v1831_v61, %v1743_v46  ;;  %v1920_v25 = vpop.f32.mrf.mxu3  ;;  %v3200_v46 = vld [vmem:[%s4754_s1 + $0x150] sm:$0xff]  ;;  %v513_v61 = vrot.slane %v511_v2, 5  ;;  %v745_v42 = vsel %vm3789_vm5, %v2765_v0, %v744_v40 }
  0xfa   : > { %v1744_v12 = vpop.f32.mrf.mxu1  ;;  %2094 = vmatpush.bf16.msra.mxu1 %v3200_v46  ;;  %v746_v46 = vrot.slane %v744_v40, 4 }
  0xfb   : > { %v1921_v6 = vadd.f32 %v1920_v25, %v1832_v53  ;;  %v1745_v28 = vadd.f32 %v1744_v12, %v4008_v3  ;;  %v999_v25 = vunpack.c.l.b16 %v741_v31  ;;  %v507_v3 = vrot.slane %v505_v58, 5 }
  0xfc   : > { %v2011_v34 = vpop.f32.mrf.mxu0  ;;  %v517_v53 = vrot.slane %v515_v50, 4  ;;  %v521_v58 = vshll.u32 %v4230_v35, 16  ;;  %v4236_v50 = vpack.c.b16 %v937_v60, %v936_v56 }
  0xfd   : > { %v4227_v9 = vadd.f32 %v2009_v16, %v1921_v6  ;;  %v4232_v18 = vpack.c.b16 %v999_v25, %v998_v45  ;;  %v508_v31 = vor.u32 %v507_v3, %v504_v17  ;;  %v4246_v17 = vld [vmem:[%s3606_s26 + $0x78] sm:$0xff] }
  0xfe   : > { %v518_v47 = vor.u32 %v517_v53, %v513_v61  ;;  %v523_v45 = vrot.slane %v521_v58, 5  ;;  %4802 = vst [vmem:[#allocation29_spill] sm:$0xff] %v4246_v17 }
  0xff   : > { %4799 = vst [vmem:[#allocation26_spill] sm:$0xff] %v4227_v9  ;;  %v509_v32 = vrot.slane %v508_v31, 4 }
 0x100   : > { %v1833_v12 = vpop.f32.mrf.mxu2  ;;  %4800 = vst [vmem:[#allocation27_spill] sm:$0xff] %v4232_v18  ;;  %v519_v33 = vrot.slane %v518_v47, 4 }
 0x101   : > { %v1834_v26 = vadd.f32 %v1833_v12, %v1745_v28  ;;  %v1922_v14 = vpop.f32.mrf.mxu3  ;;  %v747_v28 = vrot.slane %v4180_v43, 5  ;;  %v514_v56 = vsel %vm3784_vm4, %v509_v32, %v513_v61 }
 0x102   : > { %v1747_v2 = vpop.f32.mrf.mxu1  ;;  %v524_v60 = vsel %vm3784_vm4, %v519_v33, %v523_v45  ;;  %v938_v61 = vunpack.c.l.b16 %v514_v56 }
 0x103   : > { %v1923_v16 = vadd.f32 %v1922_v14, %v1834_v26  ;;  %v1748_v6 = vadd.f32 %v1747_v2, %v4031_v22  ;;  %v4251_v26 = vld [vmem:[%s3606_s26 + $0x90] sm:$0xf]  ;;  %v4254_v22 = vld [vmem:[%s3606_s26 + $0x94] sm:$0xf] }
 0x104   : > { %v2014_v59 = vpop.f32.mrf.mxu0  ;;  %v526_v14 = vshrl.u32 %v4251_v26, 16  ;;  %v529_v31 = vshll.u32 %v4251_v26, 16  ;;  %v535_v47 = vshll.u32 %v4254_v22, 16  ;;  %v539_v40 = vshrl.u32 %v4254_v22, 16 }
 0x105   : > { %1786 = vmatmul.bf16.gmra.mxu1 %v4186_v11  ;;  %1875 = vmatmul.bf16.gmra.mxu2 %v4232_v18  ;;  %v4243_v25 = vadd.f32 %v2011_v34, %v1923_v16  ;;  %v748_v34 = vsel %vm3789_vm5, %v746_v46, %v747_v28  ;;  %v939_v46 = vunpack.c.l.b16 %v524_v60 }
 0x106   : > { %1964 = vmatmul.bf16.gmra.mxu3 %v4246_v17  ;;  %v1001_v0 = vunpack.c.l.b16 %v748_v34  ;;  %v528_v32 = vrot.slane %v526_v14, 4  ;;  %v531_v33 = vrot.slane %v529_v31, 5  ;;  %v537_v45 = vrot.slane %v535_v47, 5  ;;  %v4288_v47 = vld [vmem:[%s3606_s26 + $0x84] sm:$0xff] }
 0x107   : > { %4801 = vst [vmem:[#allocation28_spill] sm:$0xff] %v4243_v25  ;;  %2053 = vmatmul.bf16.gmra.mxu0 %v4236_v50  ;;  %v4272_v25 = vld [vmem:[%s3606_s26 + $0x98] sm:$0x1]  ;;  %v754_v14 = vrot.slane %v4230_v35, 5  ;;  %v4299_v35 = vld [vmem:[%s3606_s26 + $0x9c] sm:$0xf] }
 0x108   : > { %v1836_v43 = vpop.f32.mrf.mxu2  ;;  %v545_v34 = vshll.u32 %v4272_v25, 16 }
 0x109   : > { %v1837_v3 = vadd.f32 %v1836_v43, %v1748_v6  ;;  %v1925_v53 = vpop.f32.mrf.mxu3  ;;  %v1000_v6 = vunpack.c.l.b16 %v745_v42  ;;  %v541_v43 = vrot.slane %v539_v40, 4  ;;  %v3207_v40 = vld [vmem:[%s4754_s1 + $0x188] sm:$0xff] }
 0x10a   : > { %v1749_v12 = vpop.f32.mrf.mxu1  ;;  %2184 = vmatpush.bf16.msra.mxu2 %v3207_v40 }
 0x10b   : > { %v1926_v58 = vadd.f32 %v1925_v53, %v1837_v3  ;;  %v1750_v2 = vadd.f32 %v1749_v12, %v4060_v51  ;;  %v4274_v11 = vpack.c.b16 %v1001_v0, %v1000_v6  ;;  %v751_v51 = vrot.slane %v4203_v55, 5 }
 0x10c   : > { %v2016_v16 = vpop.f32.mrf.mxu0  ;;  %v4277_v3 = vpack.c.b16 %v939_v46, %v938_v61  ;;  %v532_v53 = vor.u32 %v531_v33, %v528_v32 }
 0x10d   : > { %v4269_v28 = vadd.f32 %v2014_v59, %v1926_v58  ;;  %v542_v59 = vor.u32 %v541_v43, %v537_v45  ;;  %v753_v55 = vrot.slane %v751_v51, 4  ;;  %v550_v43 = vshrl.u32 %v4299_v35, 16 }
 0x10f   : > { %4803 = vst [vmem:[#allocation30_spill] sm:$0xff] %v4269_v28  ;;  %v755_v61 = vsel %vm3789_vm5, %v753_v55, %v754_v14 }
 0x110   : > { %v1838_v9 = vpop.f32.mrf.mxu2  ;;  %v1003_v55 = vunpack.c.l.b16 %v755_v61 }
 0x111   : > { %v1839_v17 = vadd.f32 %v1838_v9, %v1750_v2  ;;  %v1927_v18 = vpop.f32.mrf.mxu3  ;;  %v2766_v9 = vrot.slane %v4195_v19, 9  ;;  %v3215_v19 = vld [vmem:[%s4754_s1 + $0x1c8] sm:$0xff]  ;;  %v4302_v2 = vld [vmem:[%s3606_s26 + $0xa0] sm:$0xf] }
 0x112   : > { %v1752_v42 = vpop.f32.mrf.mxu1  ;;  %2273 = vmatpush.bf16.msra.mxu3 %v3215_v19 }
 0x113   : > { %v1928_v56 = vadd.f32 %v1927_v18, %v1839_v17  ;;  %v1753_v60 = vadd.f32 %v1752_v42, %v4081_v44  ;;  %v533_v44 = vrot.slane %v532_v53, 4  ;;  %v543_v18 = vrot.slane %v542_v59, 4 }
 0x114   : > { %v2019_v12 = vpop.f32.mrf.mxu0  ;;  %v547_v17 = vrot.slane %v545_v34, 5  ;;  %v752_v0 = vsel %vm3789_vm5, %v2766_v9, %v751_v51  ;;  %v553_v42 = vshll.u32 %v4299_v35, 16  ;;  %v559_v51 = vshll.u32 %v4302_v2, 16 }
 0x115   : > { %1791 = vmatmul.bf16.gmra.mxu1 %v4236_v50  ;;  %1880 = vmatmul.bf16.gmra.mxu2 %v4274_v11  ;;  %v4285_v31 = vadd.f32 %v2016_v16, %v1928_v56  ;;  %v538_v32 = vsel %vm3784_vm4, %v533_v44, %v537_v45  ;;  %v563_v56 = vshrl.u32 %v4302_v2, 16  ;;  %v3199_v45 = vld [vmem:[%s4754_s1 + $0x148] sm:$0xff]  ;;  %v1002_v9 = vunpack.c.l.b16 %v752_v0 }
 0x116   : > { %1969 = vmatmul.bf16.gmra.mxu3 %v4288_v47  ;;  %v548_v33 = vsel %vm3784_vm4, %v543_v18, %v547_v17  ;;  %2095 = vmatpush.bf16.msra.mxu1 %v3199_v45  ;;  %v552_v18 = vrot.slane %v550_v43, 4  ;;  %v555_v17 = vrot.slane %v553_v42, 5  ;;  %v561_v40 = vrot.slane %v559_v51, 5  ;;  %v4340_v45 = vld [vmem:[%s3606_s26 + $0xa8] sm:$0xf] }
 0x117   : > { %4804 = vst [vmem:[#allocation31_spill] sm:$0xff] %v4285_v31  ;;  %2058 = vmatmul.bf16.gmra.mxu0 %v4277_v3  ;;  %v941_v44 = vunpack.c.l.b16 %v548_v33  ;;  %v565_v19 = vrot.slane %v563_v56, 4  ;;  %v4329_v0 = vpack.c.b16 %v1003_v55, %v1002_v9  ;;  %v2767_v51 = vrot.slane %v4251_v26, 9 }
 0x118   : > { %v1841_v58 = vpop.f32.mrf.mxu2  ;;  %v761_v56 = vrot.slane %v4272_v25, 5 }
 0x119   : > { %v1842_v16 = vadd.f32 %v1841_v58, %v1753_v60  ;;  %v1930_v6 = vpop.f32.mrf.mxu3  ;;  %v3223_v60 = vld [vmem:[%s4754_s1 + $0x208] sm:$0xff] }
 0x11a   : > { %v1754_v46 = vpop.f32.mrf.mxu1  ;;  %2362 = vmatpush.bf16.msra.mxu0 %v3223_v60 }
 0x11b   : > { %v1931_v53 = vadd.f32 %v1930_v6, %v1842_v16  ;;  %v1755_v59 = vadd.f32 %v1754_v46, %v4119_v15  ;;  %v940_v15 = vunpack.c.l.b16 %v538_v32  ;;  %v758_v16 = vrot.slane %v4254_v22, 5  ;;  %v4327_v6 = vld [vmem:[%s3606_s26 + $0xa4] sm:$0x1] }
 0x11c   : > { %v2021_v34 = vpop.f32.mrf.mxu0  ;;  %v556_v32 = vor.u32 %v555_v17, %v552_v18  ;;  %v569_v22 = vshll.u32 %v4327_v6, 16 }
 0x11d   : > { %v4323_v14 = vadd.f32 %v2019_v12, %v1931_v53  ;;  %v4331_v12 = vpack.c.b16 %v941_v44, %v940_v15  ;;  %v566_v53 = vor.u32 %v565_v19, %v561_v40  ;;  %v759_v15 = vsel %vm3789_vm5, %v2767_v51, %v758_v16 }
 0x11e   : > { %v557_v26 = vrot.slane %v556_v32, 4  ;;  %v571_v55 = vrot.slane %v569_v22, 5  ;;  %v577_v19 = vshll.u32 %v4340_v45, 16 }
 0x11f   : > { %4805 = vst [vmem:[#allocation32_spill] sm:$0xff] %v4323_v14  ;;  %v567_v9 = vrot.slane %v566_v53, 4 }
 0x120   : > { %v1843_v58 = vpop.f32.mrf.mxu2 }
 0x121   : > { %v1844_v46 = vadd.f32 %v1843_v58, %v1755_v59  ;;  %v1932_v31 = vpop.f32.mrf.mxu3  ;;  %v760_v59 = vrot.slane %v758_v16, 4  ;;  %v562_v16 = vsel %vm3784_vm4, %v557_v26, %v561_v40  ;;  %v572_v22 = vsel %vm3784_vm4, %v567_v9, %v571_v55 }
 0x122   : > { %v1757_v61 = vpop.f32.mrf.mxu1  ;;  %v943_v28 = vunpack.c.l.b16 %v572_v22  ;;  %v765_v40 = vrot.slane %v4302_v2, 5  ;;  %v4395_v22 = vld [vmem:[%s3606_s26 + $0xb4] sm:$0xf] }
 0x123   : > { %v1933_v33 = vadd.f32 %v1932_v31, %v1844_v46  ;;  %v1758_v43 = vadd.f32 %v1757_v61, %v4142_v8  ;;  %v4345_v31 = vld [vmem:[%s3606_s26 + $0x90] sm:$0xff]  ;;  %v4350_v8 = vld [vmem:[%s3606_s26 + $0xac] sm:$0xf]  ;;  %v762_v44 = vsel %vm3789_vm5, %v760_v59, %v761_v56  ;;  %v579_v56 = vrot.slane %v577_v19, 5 }
 0x124   : > { %v2024_v42 = vpop.f32.mrf.mxu0  ;;  %4807 = vst [vmem:[#allocation34_spill] sm:$0xff] %v4345_v31  ;;  %v583_v58 = vshll.u32 %v4350_v8, 16  ;;  %v587_v46 = vshrl.u32 %v4350_v8, 16  ;;  %v1005_v51 = vunpack.c.l.b16 %v762_v44 }
 0x125   : > { %1796 = vmatmul.bf16.gmra.mxu1 %v4277_v3  ;;  %1885 = vmatmul.bf16.gmra.mxu2 %v4329_v0  ;;  %v4342_v60 = vadd.f32 %v2021_v34, %v1933_v33  ;;  %v574_v34 = vshrl.u32 %v4340_v45, 16 }
 0x126   : > { %1974 = vmatmul.bf16.gmra.mxu3 %v4345_v31  ;;  %v942_v31 = vunpack.c.l.b16 %v562_v16 }
 0x127   : > { %4806 = vst [vmem:[#allocation33_spill] sm:$0xff] %v4342_v60  ;;  %2063 = vmatmul.bf16.gmra.mxu0 %v4331_v12  ;;  %v576_v59 = vrot.slane %v574_v34, 4  ;;  %v589_v60 = vrot.slane %v587_v46, 4  ;;  %v767_v46 = vrot.slane %v765_v40, 4 }
 0x128   : > { %v1846_v25 = vpop.f32.mrf.mxu2  ;;  %v4374_v34 = vpack.c.b16 %v943_v28, %v942_v31  ;;  %v4383_v28 = vld [vmem:[%s3606_s26 + $0x9c] sm:$0xff] }
 0x129   : > { %v1847_v18 = vadd.f32 %v1846_v25, %v1758_v43  ;;  %v1935_v17 = vpop.f32.mrf.mxu3  ;;  %v1004_v43 = vunpack.c.l.b16 %v759_v15  ;;  %v585_v25 = vrot.slane %v583_v58, 5  ;;  %v580_v9 = vor.u32 %v579_v56, %v576_v59  ;;  %4810 = vst [vmem:[#allocation37_spill] sm:$0xff] %v4383_v28 }
 0x12a   : > { %v1759_v61 = vpop.f32.mrf.mxu1  ;;  %v2768_v58 = vrot.slane %v4299_v35, 9  ;;  %v3206_v35 = vld [vmem:[%s4754_s1 + $0x180] sm:$0xff] }
 0x12b   : > { %v1936_v32 = vadd.f32 %v1935_v17, %v1847_v18  ;;  %v1760_v33 = vadd.f32 %v1759_v61, %v4170_v5  ;;  %v4368_v18 = vld [vmem:[%s3606_s26 + $0xb0] sm:$0x1]  ;;  %v4370_v17 = vpack.c.b16 %v1005_v51, %v1004_v43  ;;  %v590_v55 = vor.u32 %v589_v60, %v585_v25  ;;  %2185 = vmatpush.bf16.msra.mxu2 %v3206_v35 }
 0x12c   : > { %v2026_v53 = vpop.f32.mrf.mxu0  ;;  %v593_v15 = vshll.u32 %v4368_v18, 16  ;;  %v581_v2 = vrot.slane %v580_v9, 4  ;;  %v766_v51 = vsel %vm3789_vm5, %v2768_v58, %v765_v40  ;;  %v598_v9 = vshrl.u32 %v4395_v22, 16  ;;  %v3198_v58 = vld [vmem:[%s4754_s1 + $0x140] sm:$0xff] }
 0x12d   : > { %v4365_v14 = vadd.f32 %v2024_v42, %v1936_v32  ;;  %v768_v32 = vrot.slane %v4327_v6, 5  ;;  %v591_v60 = vrot.slane %v590_v55, 4  ;;  %v3214_v6 = vld [vmem:[%s4754_s1 + $0x1c0] sm:$0xff]  ;;  %v601_v55 = vshll.u32 %v4395_v22, 16  ;;  %2096 = vmatpush.bf16.msra.mxu1 %v3198_v58 }
 0x12e   : > { %2274 = vmatpush.bf16.msra.mxu3 %v3214_v6  ;;  %v600_v35 = vrot.slane %v598_v9, 4 }
 0x12f   : > { %4808 = vst [vmem:[#allocation35_spill] sm:$0xff] %v4365_v14  ;;  %v603_v6 = vrot.slane %v601_v55, 5 }
 0x130   : > { %v1848_v5 = vpop.f32.mrf.mxu2 }
 0x131   : > { %v1849_v26 = vadd.f32 %v1848_v5, %v1760_v33  ;;  %v1937_v61 = vpop.f32.mrf.mxu3  ;;  %v595_v33 = vrot.slane %v593_v15, 5  ;;  %v769_v5 = vsel %vm3789_vm5, %v767_v46, %v768_v32  ;;  %v1006_v46 = vunpack.c.l.b16 %v766_v51 }
 0x132   : > { %v1762_v44 = vpop.f32.mrf.mxu1  ;;  %v1007_v32 = vunpack.c.l.b16 %v769_v5  ;;  %v772_v5 = vrot.slane %v4350_v8, 5  ;;  %v4436_v8 = vld [vmem:[%s3606_s26 + $0xa8] sm:$0xff] }
 0x133   : > { %v1938_v42 = vadd.f32 %v1937_v61, %v1849_v26  ;;  %v1763_v31 = vadd.f32 %v1762_v44, %v3966_v23  ;;  %v586_v26 = vsel %vm3784_vm4, %v581_v2, %v585_v25  ;;  %v596_v23 = vsel %vm3784_vm4, %v591_v60, %v595_v33  ;;  %v3222_v25 = vld [vmem:[%s4754_s1 + $0x200] sm:$0xff] }
 0x134   : > { %v2029_v19 = vpop.f32.mrf.mxu0  ;;  %v944_v2 = vunpack.c.l.b16 %v586_v26  ;;  %v945_v60 = vunpack.c.l.b16 %v596_v23  ;;  %2363 = vmatpush.bf16.msra.mxu0 %v3222_v25  ;;  %v4424_v51 = vpack.c.b16 %v1007_v32, %v1006_v46  ;;  %v4443_v46 = vld [vmem:[%s3606_s26 + $0xc0] sm:$0xf] }
 0x135   : > { %1801 = vmatmul.bf16.gmra.mxu1 %v4331_v12  ;;  %1890 = vmatmul.bf16.gmra.mxu2 %v4370_v17  ;;  %v4380_v16 = vadd.f32 %v2026_v53, %v1938_v42  ;;  %v4398_v53 = vld [vmem:[%s3606_s26 + $0xb8] sm:$0xf]  ;;  %4812 = vst [vmem:[#allocation39_spill] sm:$0xff] %v4443_v46 }
 0x136   : > { %1979 = vmatmul.bf16.gmra.mxu3 %v4383_v28  ;;  %v607_v40 = vshll.u32 %v4398_v53, 16  ;;  %v611_v15 = vshrl.u32 %v4398_v53, 16  ;;  %v4427_v23 = vpack.c.b16 %v945_v60, %v944_v2 }
 0x137   : > { %4809 = vst [vmem:[#allocation36_spill] sm:$0xff] %v4380_v16  ;;  %2068 = vmatmul.bf16.gmra.mxu0 %v4374_v34 }
 0x138   : > { %v1851_v43 = vpop.f32.mrf.mxu2 }
 0x139   : > { %v1852_v59 = vadd.f32 %v1851_v43, %v1763_v31  ;;  %v1940_v56 = vpop.f32.mrf.mxu3  ;;  %v609_v31 = vrot.slane %v607_v40, 5  ;;  %v613_v43 = vrot.slane %v611_v15, 4 }
 0x13a   : > { %v1764_v61 = vpop.f32.mrf.mxu1 }
 0x13b   : > { %v1941_v44 = vadd.f32 %v1940_v56, %v1852_v59  ;;  %v1765_v59 = vadd.f32 %v1764_v61, %v3998_v39  ;;  %v4422_v56 = vld [vmem:[%s3606_s26 + $0xbc] sm:$0x1]  ;;  %v614_v9 = vor.u32 %v613_v43, %v609_v31  ;;  %v774_v61 = vrot.slane %v772_v5, 4 }
 0x13c   : > { %v2031_v42 = vpop.f32.mrf.mxu0  ;;  %v617_v55 = vshll.u32 %v4422_v56, 16  ;;  %v785_v43 = vshrl.u32 %v4443_v46, 16 }
 0x13d   : > { %v4418_v33 = vadd.f32 %v2029_v19, %v1941_v44  ;;  %v604_v19 = vor.u32 %v603_v6, %v600_v35  ;;  %v775_v44 = vrot.slane %v4368_v18, 5 }
 0x13e   : > { %v619_v58 = vrot.slane %v617_v55, 5 }
 0x13f   : > { %v776_v6 = vsel %vm3789_vm5, %v774_v61, %v775_v44  ;;  %v787_v44 = vrot.slane %v785_v43, 4 }
 0x140   : > { %v1853_v16 = vpop.f32.mrf.mxu2 }
 0x141   : > { %v1854_v14 = vadd.f32 %v1853_v16, %v1765_v59  ;;  %v1942_v28 = vpop.f32.mrf.mxu3  ;;  %v2769_v16 = vrot.slane %v4340_v45, 9  ;;  %v4446_v45 = vld [vmem:[%s3606_s26 + $0xc4] sm:$0xf] }
 0x142   : > { %v1767_v26 = vpop.f32.mrf.mxu1 }
 0x143   : > { %v1943_v40 = vadd.f32 %v1942_v28, %v1854_v14  ;;  %v605_v14 = vrot.slane %v604_v19, 4  ;;  %v615_v28 = vrot.slane %v614_v9, 4  ;;  %v1768_v25 = vadd.f32 %v1767_v26, %v4027_v27 }
 0x144   : > { %v2034_v39 = vpop.f32.mrf.mxu0  ;;  %v773_v60 = vsel %vm3789_vm5, %v2769_v16, %v772_v5  ;;  %v788_v19 = vshll.u32 %v4443_v46, 16  ;;  %v794_v9 = vshll.u32 %v4446_v45, 16  ;;  %v798_v5 = vshrl.u32 %v4446_v45, 16 }
 0x145   : > { %1806 = vmatmul.bf16.gmra.mxu1 %v4374_v34  ;;  %1895 = vmatmul.bf16.gmra.mxu2 %v4424_v51  ;;  %v4433_v15 = vadd.f32 %v2031_v42, %v1943_v40  ;;  %v610_v18 = vsel %vm3784_vm4, %v605_v14, %v609_v31  ;;  %v620_v27 = vsel %vm3784_vm4, %v615_v28, %v619_v58  ;;  %v1008_v55 = vunpack.c.l.b16 %v773_v60 }
 0x146   : > { %1984 = vmatmul.bf16.gmra.mxu3 %v4436_v8  ;;  %v1009_v40 = vunpack.c.l.b16 %v776_v6  ;;  %v946_v61 = vunpack.c.l.b16 %v610_v18  ;;  %v947_v31 = vunpack.c.l.b16 %v620_v27  ;;  %v790_v28 = vrot.slane %v788_v19, 5  ;;  %v4477_v19 = vld [vmem:[%s3606_s26 + $0xb4] sm:$0xff] }
 0x147   : > { %4811 = vst [vmem:[#allocation38_spill] sm:$0xff] %v4433_v15  ;;  %2073 = vmatmul.bf16.gmra.mxu0 %v4427_v23  ;;  %v796_v58 = vrot.slane %v794_v9, 5  ;;  %v782_v9 = vrot.slane %v4422_v56, 5 }
 0x148   : > { %v1856_v32 = vpop.f32.mrf.mxu2  ;;  %v4466_v15 = vpack.c.b16 %v1009_v40, %v1008_v55  ;;  %v4468_v6 = vpack.c.b16 %v947_v31, %v946_v61  ;;  %v791_v43 = vor.u32 %v790_v28, %v787_v44 }
 0x149   : > { %v1857_v42 = vadd.f32 %v1856_v32, %v1768_v25  ;;  %v1945_v2 = vpop.f32.mrf.mxu3  ;;  %v800_v25 = vrot.slane %v798_v5, 4 }
 0x14a   : > { %v1769_v35 = vpop.f32.mrf.mxu1  ;;  %v792_v55 = vrot.slane %v791_v43, 4 }
 0x14b   : > { %v1946_v59 = vadd.f32 %v1945_v2, %v1857_v42  ;;  %v1770_v14 = vadd.f32 %v1769_v35, %v4058_v1  ;;  %v4464_v42 = vld [vmem:[%s3606_s26 + $0xc8] sm:$0x1]  ;;  %v801_v1 = vor.u32 %v800_v25, %v796_v58 }
 0x14c   : > { %v2036_v26 = vpop.f32.mrf.mxu0  ;;  %v804_v35 = vshll.u32 %v4464_v42, 16  ;;  %v797_v56 = vsel %vm3784_vm4, %v792_v55, %v796_v58 }
 0x14d   : > { %v4460_v16 = vadd.f32 %v2034_v39, %v1946_v59  ;;  %v779_v39 = vrot.slane %v4398_v53, 5  ;;  %v2770_v53 = vrot.slane %v4395_v22, 9  ;;  %v802_v40 = vrot.slane %v801_v1, 4 }
 0x14e   : > { %v806_v61 = vrot.slane %v804_v35, 5  ;;  %v1048_v43 = vunpack.c.l.b16 %v797_v56 }
 0x14f   : > { %v780_v28 = vsel %vm3789_vm5, %v2770_v53, %v779_v39 }
 0x150   : > { %v1858_v32 = vpop.f32.mrf.mxu2 }
 0x151   : > { %v1859_v2 = vadd.f32 %v1858_v32, %v1770_v14  ;;  %v1947_v46 = vpop.f32.mrf.mxu3 }
 0x152   : > { %v1772_v60 = vpop.f32.mrf.mxu1 }
 0x153   : > { %v1948_v18 = vadd.f32 %v1947_v46, %v1859_v2  ;;  %v781_v46 = vrot.slane %v779_v39, 4  ;;  %v1773_v5 = vadd.f32 %v1772_v60, %v4077_v13  ;;  %v807_v13 = vsel %vm3784_vm4, %v802_v40, %v806_v61 }
 0x154   : > { %v2039_v27 = vpop.f32.mrf.mxu0  ;;  %v1010_v2 = vunpack.c.l.b16 %v780_v28  ;;  %v1049_v1 = vunpack.c.l.b16 %v807_v13 }
 0x155   : > { %1811 = vmatmul.bf16.gmra.mxu1 %v4427_v23  ;;  %1900 = vmatmul.bf16.gmra.mxu2 %v4466_v15  ;;  %v4474_v59 = vadd.f32 %v2036_v26, %v1948_v18  ;;  %v783_v25 = vsel %vm3789_vm5, %v781_v46, %v782_v9 }
 0x156   : > { %1989 = vmatmul.bf16.gmra.mxu3 %v4477_v19  ;;  %v1011_v60 = vunpack.c.l.b16 %v783_v25  ;;  %v4500_v58 = vpack.c.b16 %v1049_v1, %v1048_v43 }
 0x157   : > { %2078 = vmatmul.bf16.gmra.mxu0 %v4468_v6 }
 0x158   : > { %v1861_v31 = vpop.f32.mrf.mxu2  ;;  %v4495_v9 = vpack.c.b16 %v1011_v60, %v1010_v2 }
 0x159   : > { %v1862_v44 = vadd.f32 %v1861_v31, %v1773_v5  ;;  %v1950_v26 = vpop.f32.mrf.mxu3  ;;  %v4498_v31 = vld [vmem:[%s3606_s26 + $0xc0] sm:$0xff] }
 0x15a   : > { %v1774_v14 = vpop.f32.mrf.mxu1 }
 0x15b   : > { %v1951_v22 = vadd.f32 %v1950_v26, %v1862_v44  ;;  %v1775_v39 = vadd.f32 %v1774_v14, %v4113_v7 }
 0x15c   : > { %v2041_v32 = vpop.f32.mrf.mxu0 }
 0x15d   : > { %v4492_v18 = vadd.f32 %v2039_v27, %v1951_v22 }
 0x160   : > { %v1863_v35 = vpop.f32.mrf.mxu2 }
 0x161   : > { %v1864_v53 = vadd.f32 %v1863_v35, %v1775_v39  ;;  %v1952_v46 = vpop.f32.mrf.mxu3 }
 0x162   : > { %v1777_v5 = vpop.f32.mrf.mxu1 }
 0x163   : > { %v1953_v55 = vadd.f32 %v1952_v46, %v1864_v53  ;;  %v1778_v7 = vadd.f32 %v1777_v5, %v4137_v20  ;;  %v3403_v20 = vld [vmem:[%s3606_s26 + $0x18] sm:$0xff] }
 0x164   : > { %v2044_v40 = vpop.f32.mrf.mxu0 }
 0x165   : > { %1816 = vmatmul.bf16.gmra.mxu1 %v4468_v6  ;;  %1905 = vmatmul.bf16.gmra.mxu2 %v4495_v9  ;;  %v4504_v27 = vadd.f32 %v2041_v32, %v1953_v55 }
 0x166   : > { %1994 = vmatmul.bf16.gmra.mxu3 %v4498_v31 }
 0x167   : > { %2083 = vmatmul.bf16.gmra.mxu0 %v4500_v58 }
 0x168   : > { %v1866_v61 = vpop.f32.mrf.mxu2 }
 0x169   : > { %v1867_v44 = vadd.f32 %v1866_v61, %v1778_v7  ;;  %v1955_v26 = vpop.f32.mrf.mxu3 }
 0x16a   : > { %v1779_v14 = vpop.f32.mrf.mxu1 }
 0x16b   : > { %v1956_v28 = vadd.f32 %v1955_v26, %v1867_v44  ;;  %v1780_v56 = vadd.f32 %v1779_v14, %v4160_v30 }
 0x16c   : > { %v2046_v25 = vpop.f32.mrf.mxu0 }
 0x16d   : > { %v4509_v22 = vadd.f32 %v2044_v40, %v1956_v28 }
 0x170   : > { %v1868_v13 = vpop.f32.mrf.mxu2 }
 0x171   : > { %v1869_v32 = vadd.f32 %v1868_v13, %v1780_v56  ;;  %v1957_v2 = vpop.f32.mrf.mxu3 }
 0x172   : > { %v1782_v60 = vpop.f32.mrf.mxu1 }
 0x173   : > { %v1958_v43 = vadd.f32 %v1957_v2, %v1869_v32  ;;  %v1783_v35 = vadd.f32 %v1782_v60, %v3985_v57  ;;  %v3404_v57 = vld [vmem:[%s3606_s26 + $0x24] sm:$0xff] }
 0x174   : > { %v2049_v1 = vpop.f32.mrf.mxu0 }
 0x175   : > { %2097 = vmatmul.bf16.vlgmr.msra.gmra.mxu1 %v3855_v49  ;;  %2186 = vmatmul.bf16.vlgmr.msra.gmra.mxu2 %v3403_v20  ;;  %v4514_v39 = vadd.f32 %v2046_v25, %v1958_v43 }
 0x176   : > { %2275 = vmatmul.bf16.vlgmr.msra.gmra.mxu3 %v3858_v52 }
 0x177   : > { %2364 = vmatmul.bf16.vlgmr.msra.gmra.mxu0 %v3887_v63 }
 0x178   : > { %v1871_v30 = vpop.f32.mrf.mxu2 }
 0x179   : > { %v1872_v53 = vadd.f32 %v1871_v30, %v1783_v35  ;;  %v1960_v46 = vpop.f32.mrf.mxu3 }
 0x17a   : > { %v1784_v5 = vpop.f32.mrf.mxu1 }
 0x17b   : > { %v1961_v55 = vadd.f32 %v1960_v46, %v1872_v53  ;;  %v1785_v49 = vadd.f32 %v1784_v5, %v4017_v62 }
 0x17c   : > { %v2051_v40 = vpop.f32.mrf.mxu0 }
 0x17d   : > { %v4519_v7 = vadd.f32 %v2049_v1, %v1961_v55 }
 0x180   : > { %v1873_v61 = vpop.f32.mrf.mxu2 }
 0x181   : > { %v1874_v44 = vadd.f32 %v1873_v61, %v1785_v49  ;;  %v1962_v26 = vpop.f32.mrf.mxu3 }
 0x182   : > { %v1787_v14 = vpop.f32.mrf.mxu1 }
 0x183   : > { %v1963_v52 = vadd.f32 %v1962_v26, %v1874_v44  ;;  %v1788_v56 = vadd.f32 %v1787_v14, %v4046_v54  ;;  %v3405_v54 = vld [vmem:[%s3606_s26 + $0x30] sm:$0xff] }
 0x184   : > { %v2054_v28 = vpop.f32.mrf.mxu0 }
 0x185   : > { %2102 = vmatmul.bf16.gmra.mxu1 %v3887_v63  ;;  %2191 = vmatmul.bf16.gmra.mxu2 %v3404_v57  ;;  %v4524_v25 = vadd.f32 %v2051_v40, %v1963_v52 }
 0x186   : > { %2280 = vmatmul.bf16.gmra.mxu3 %v3889_v21 }
 0x187   : > { %2369 = vmatmul.bf16.gmra.mxu0 %v3931_v38 }
 0x188   : > { %v1876_v62 = vpop.f32.mrf.mxu2 }
 0x189   : > { %v1877_v13 = vadd.f32 %v1876_v62, %v1788_v56  ;;  %v1965_v32 = vpop.f32.mrf.mxu3 }
 0x18a   : > { %v1789_v2 = vpop.f32.mrf.mxu1 }
 0x18b   : > { %v1966_v60 = vadd.f32 %v1965_v32, %v1877_v13  ;;  %v1790_v63 = vadd.f32 %v1789_v2, %v4069_v10  ;;  %v4813_v32 = vld [vmem:[#allocation10_spill] sm:$0xff]  ;;  %v4814_v2 = vld [vmem:[#allocation20_spill] sm:$0xff] }
 0x18c   : > { %v2056_v43 = vpop.f32.mrf.mxu0 }
 0x18d   : > { %v4529_v1 = vadd.f32 %v2054_v28, %v1966_v60 }
 0x190   : > { %v1878_v20 = vpop.f32.mrf.mxu2 }
 0x191   : > { %v1879_v35 = vadd.f32 %v1878_v20, %v1790_v63  ;;  %v1967_v30 = vpop.f32.mrf.mxu3 }
 0x192   : > { %v1792_v53 = vpop.f32.mrf.mxu1 }
 0x193   : > { %v1968_v21 = vadd.f32 %v1967_v30, %v1879_v35  ;;  %v1793_v55 = vadd.f32 %v1792_v53, %v4101_v24  ;;  %v3406_v24 = vld [vmem:[%s3606_s26 + $0x3c] sm:$0xff] }
 0x194   : > { %v2059_v46 = vpop.f32.mrf.mxu0 }
 0x195   : > { %2107 = vmatmul.bf16.gmra.mxu1 %v3931_v38  ;;  %2196 = vmatmul.bf16.gmra.mxu2 %v3405_v54  ;;  %v4534_v5 = vadd.f32 %v2056_v43, %v1968_v21 }
 0x196   : > { %2285 = vmatmul.bf16.gmra.mxu3 %v3934_v4 }
 0x197   : > { %2374 = vmatmul.bf16.gmra.mxu0 %v3963_v36 }
 0x198   : > { %v1881_v10 = vpop.f32.mrf.mxu2 }
 0x199   : > { %v1882_v40 = vadd.f32 %v1881_v10, %v1793_v55  ;;  %v1970_v49 = vpop.f32.mrf.mxu3 }
 0x19a   : > { %v1794_v61 = vpop.f32.mrf.mxu1 }
 0x19b   : > { %v1971_v44 = vadd.f32 %v1970_v49, %v1882_v40  ;;  %v1795_v38 = vadd.f32 %v1794_v61, %v4130_v48  ;;  %v3407_v49 = vld [vmem:[%s3606_s26 + $0x48] sm:$0xff] }
 0x19c   : > { %v2061_v26 = vpop.f32.mrf.mxu0 }
 0x19d   : > { %v4539_v14 = vadd.f32 %v2059_v46, %v1971_v44  ;;  %v4816_v44 = vld [vmem:[#allocation11_spill] sm:$0xff] }
 0x1a0   : > { %v1883_v52 = vpop.f32.mrf.mxu2 }
 0x1a1   : > { %v1884_v28 = vadd.f32 %v1883_v52, %v1795_v38  ;;  %v1972_v57 = vpop.f32.mrf.mxu3  ;;  %v4818_v38 = vld [vmem:[#allocation8_spill] sm:$0xff] }
 0x1a2   : > { %v1797_v56 = vpop.f32.mrf.mxu1 }
 0x1a3   : > { %v1973_v4 = vadd.f32 %v1972_v57, %v1884_v28  ;;  %v1798_v60 = vadd.f32 %v1797_v56, %v4814_v2 }
 0x1a4   : > { %v2064_v62 = vpop.f32.mrf.mxu0 }
 0x1a5   : > { %2112 = vmatmul.bf16.gmra.mxu1 %v3963_v36  ;;  %2201 = vmatmul.bf16.gmra.mxu2 %v3406_v24  ;;  %v4544_v13 = vadd.f32 %v2061_v26, %v1973_v4  ;;  %v4815_v36 = vld [vmem:[#allocation22_spill] sm:$0xff] }
 0x1a6   : > { %2290 = vmatmul.bf16.gmra.mxu3 %v3968_v41  ;;  %v4817_v26 = vld [vmem:[#allocation14_spill] sm:$0xff] }
 0x1a7   : > { %2379 = vmatmul.bf16.gmra.mxu0 %v4813_v32 }
 0x1a8   : > { %v1886_v48 = vpop.f32.mrf.mxu2 }
 0x1a9   : > { %v1887_v43 = vadd.f32 %v1886_v48, %v1798_v60  ;;  %v1975_v63 = vpop.f32.mrf.mxu3 }
 0x1aa   : > { %v1799_v20 = vpop.f32.mrf.mxu1 }
 0x1ab   : > { %v1976_v35 = vadd.f32 %v1975_v63, %v1887_v43  ;;  %v1800_v21 = vadd.f32 %v1799_v20, %v4815_v36  ;;  %v3408_v36 = vld [vmem:[%s3606_s26 + $0x54] sm:$0xff] }
 0x1ac   : > { %v2066_v30 = vpop.f32.mrf.mxu0 }
 0x1ad   : > { %v4549_v53 = vadd.f32 %v2064_v62, %v1976_v35 }
 0x1b0   : > { %v1888_v46 = vpop.f32.mrf.mxu2 }
 0x1b1   : > { %v1889_v54 = vadd.f32 %v1888_v46, %v1800_v21  ;;  %v1977_v55 = vpop.f32.mrf.mxu3  ;;  %v4820_v46 = vld [vmem:[#allocation15_spill] sm:$0xff] }
 0x1b2   : > { %v1802_v10 = vpop.f32.mrf.mxu1 }
 0x1b3   : > { %v1978_v41 = vadd.f32 %v1977_v55, %v1889_v54  ;;  %v1803_v52 = vadd.f32 %v1802_v10, %v4818_v38  ;;  %v4821_v54 = vld [vmem:[#allocation18_spill] sm:$0xff]  ;;  %v4822_v55 = vld [vmem:[#allocation12_spill] sm:$0xff] }
 0x1b4   : > { %v2069_v40 = vpop.f32.mrf.mxu0 }
 0x1b5   : > { %2117 = vmatmul.bf16.gmra.mxu1 %v4813_v32  ;;  %2206 = vmatmul.bf16.gmra.mxu2 %v3407_v49  ;;  %v4554_v61 = vadd.f32 %v2066_v30, %v1978_v41  ;;  %v4819_v32 = vld [vmem:[#allocation9_spill] sm:$0xff] }
 0x1b6   : > { %2295 = vmatmul.bf16.gmra.mxu3 %v4816_v44 }
 0x1b7   : > { %2384 = vmatmul.bf16.gmra.mxu0 %v4817_v26 }
 0x1b8   : > { %v1891_v28 = vpop.f32.mrf.mxu2 }
 0x1b9   : > { %v1892_v57 = vadd.f32 %v1891_v28, %v1803_v52  ;;  %v1980_v56 = vpop.f32.mrf.mxu3 }
 0x1ba   : > { %v1804_v4 = vpop.f32.mrf.mxu1 }
 0x1bb   : > { %v1981_v62 = vadd.f32 %v1980_v56, %v1892_v57  ;;  %v1805_v60 = vadd.f32 %v1804_v4, %v4819_v32 }
 0x1bc   : > { %v2071_v24 = vpop.f32.mrf.mxu0 }
 0x1bd   : > { %v4559_v2 = vadd.f32 %v2069_v40, %v1981_v62 }
 0x1c0   : > { %v1893_v48 = vpop.f32.mrf.mxu2 }
 0x1c1   : > { %v1894_v43 = vadd.f32 %v1893_v48, %v1805_v60  ;;  %v1982_v63 = vpop.f32.mrf.mxu3  ;;  %v3409_v48 = vld [vmem:[%s3606_s26 + $0x60] sm:$0xff] }
 0x1c2   : > { %v1807_v20 = vpop.f32.mrf.mxu1 }
 0x1c3   : > { %v1983_v35 = vadd.f32 %v1982_v63, %v1894_v43  ;;  %v1808_v10 = vadd.f32 %v1807_v20, %v4822_v55  ;;  %v4824_v63 = vld [vmem:[#allocation19_spill] sm:$0xff]  ;;  %v4825_v20 = vld [vmem:[#allocation24_spill] sm:$0xff] }
 0x1c4   : > { %v2074_v30 = vpop.f32.mrf.mxu0 }
 0x1c5   : > { %2122 = vmatmul.bf16.gmra.mxu1 %v4817_v26  ;;  %2211 = vmatmul.bf16.gmra.mxu2 %v3408_v36  ;;  %v4564_v21 = vadd.f32 %v2071_v24, %v1983_v35  ;;  %v4823_v26 = vld [vmem:[#allocation13_spill] sm:$0xff]  ;;  %v4826_v35 = vld [vmem:[#allocation16_spill] sm:$0xff] }
 0x1c6   : > { %2300 = vmatmul.bf16.gmra.mxu3 %v4820_v46 }
 0x1c7   : > { %2389 = vmatmul.bf16.gmra.mxu0 %v4821_v54 }
 0x1c8   : > { %v1896_v41 = vpop.f32.mrf.mxu2 }
 0x1c9   : > { %v1897_v40 = vadd.f32 %v1896_v41, %v1808_v10  ;;  %v1985_v49 = vpop.f32.mrf.mxu3 }
 0x1ca   : > { %v1809_v44 = vpop.f32.mrf.mxu1 }
 0x1cb   : > { %v1986_v38 = vadd.f32 %v1985_v49, %v1897_v40  ;;  %v1810_v57 = vadd.f32 %v1809_v44, %v4823_v26 }
 0x1cc   : > { %v2076_v52 = vpop.f32.mrf.mxu0 }
 0x1cd   : > { %v4569_v28 = vadd.f32 %v2074_v30, %v1986_v38 }
 0x1d0   : > { %v1898_v56 = vpop.f32.mrf.mxu2 }
 0x1d1   : > { %v1899_v4 = vadd.f32 %v1898_v56, %v1810_v57  ;;  %v1987_v62 = vpop.f32.mrf.mxu3 }
 0x1d2   : > { %v1812_v24 = vpop.f32.mrf.mxu1 }
 0x1d3   : > { %v1988_v32 = vadd.f32 %v1987_v62, %v1899_v4  ;;  %v1813_v30 = vadd.f32 %v1812_v24, %v4826_v35  ;;  %v3410_v62 = vld [vmem:[%s3606_s26 + $0x6c] sm:$0xff] }
 0x1d4   : > { %v2079_v60 = vpop.f32.mrf.mxu0 }
 0x1d5   : > { %2127 = vmatmul.bf16.gmra.mxu1 %v4821_v54  ;;  %2216 = vmatmul.bf16.gmra.mxu2 %v3409_v48  ;;  %v4574_v43 = vadd.f32 %v2076_v52, %v1988_v32  ;;  %v4827_v54 = vld [vmem:[#allocation17_spill] sm:$0xff]  ;;  %v4829_v48 = vld [vmem:[#allocation27_spill] sm:$0xff] }
 0x1d6   : > { %2305 = vmatmul.bf16.gmra.mxu3 %v4824_v63  ;;  %v4828_v32 = vld [vmem:[#allocation25_spill] sm:$0xff] }
 0x1d7   : > { %2394 = vmatmul.bf16.gmra.mxu0 %v4825_v20 }
 0x1d8   : > { %v1901_v36 = vpop.f32.mrf.mxu2 }
 0x1d9   : > { %v1902_v46 = vadd.f32 %v1901_v36, %v1813_v30  ;;  %v1990_v55 = vpop.f32.mrf.mxu3 }
 0x1da   : > { %v1814_v10 = vpop.f32.mrf.mxu1 }
 0x1db   : > { %v1991_v41 = vadd.f32 %v1990_v55, %v1902_v46  ;;  %v1815_v44 = vadd.f32 %v1814_v10, %v4827_v54  ;;  %v4831_v54 = vld [vmem:[#allocation23_spill] sm:$0xff] }
 0x1dc   : > { %v2081_v40 = vpop.f32.mrf.mxu0 }
 0x1dd   : > { %v4579_v49 = vadd.f32 %v2079_v60, %v1991_v41  ;;  %v4830_v60 = vld [vmem:[#allocation21_spill] sm:$0xff] }
 0x1e0   : > { %v1903_v38 = vpop.f32.mrf.mxu2 }
 0x1e1   : > { %v1904_v52 = vadd.f32 %v1903_v38, %v1815_v44  ;;  %v1992_v26 = vpop.f32.mrf.mxu3 }
 0x1e2   : > { %v1817_v57 = vpop.f32.mrf.mxu1 }
 0x1e3   : > { %v1993_v56 = vadd.f32 %v1992_v26, %v1904_v52  ;;  %v1818_v63 = vadd.f32 %v1817_v57, %v4830_v60  ;;  %v4832_v57 = vld [vmem:[#allocation29_spill] sm:$0xff] }
 0x1e4   : > { %v2084_v4 = vpop.f32.mrf.mxu0 }
 0x1e5   : > { %2132 = vmatmul.bf16.gmra.mxu1 %v4825_v20  ;;  %2221 = vmatmul.bf16.gmra.mxu2 %v3410_v62  ;;  %v4584_v24 = vadd.f32 %v2081_v40, %v1993_v56 }
 0x1e6   : > { %2310 = vmatmul.bf16.gmra.mxu3 %v4828_v32 }
 0x1e7   : > { %2399 = vmatmul.bf16.gmra.mxu0 %v4829_v48 }
 0x1e8   : > { %v1906_v35 = vpop.f32.mrf.mxu2 }
 0x1e9   : > { %v1907_v30 = vadd.f32 %v1906_v35, %v1818_v63  ;;  %v1995_v36 = vpop.f32.mrf.mxu3 }
 0x1ea   : > { %v1819_v46 = vpop.f32.mrf.mxu1 }
 0x1eb   : > { %v1996_v55 = vadd.f32 %v1995_v36, %v1907_v30  ;;  %v1820_v20 = vadd.f32 %v1819_v46, %v4831_v54 }
 0x1ec   : > { %v2086_v10 = vpop.f32.mrf.mxu0 }
 0x1ed   : > { %v4589_v41 = vadd.f32 %v2084_v4, %v1996_v55  ;;  %v4833_v4 = vld [vmem:[#allocation26_spill] sm:$0xff]  ;;  %v4834_v55 = vld [vmem:[#allocation28_spill] sm:$0xff] }
 0x1f0   : > { %v1908_v44 = vpop.f32.mrf.mxu2 }
 0x1f1   : > { %v1909_v38 = vadd.f32 %v1908_v44, %v1820_v20  ;;  %v1997_v40 = vpop.f32.mrf.mxu3 }
 0x1f2   : > { %v2098_v52 = vpop.f32.mrf.mxu1 }
 0x1f3   : > { %v1998_v26 = vadd.f32 %v1997_v40, %v1909_v38  ;;  %v2099_v32 = vadd.f32 %v2098_v52, %v4833_v4 }
 0x1f4   : > { %v2365_v56 = vpop.f32.mrf.mxu0 }
 0x1f5   : > { %2137 = vmatmul.bf16.gmra.mxu1 %v4829_v48  ;;  %2226 = vmatmul.bf16.gmra.mxu2 %v4832_v57  ;;  %v4594_v62 = vadd.f32 %v2086_v10, %v1998_v26 }
 0x1f6   : > { %2315 = vmatmul.bf16.gmra.mxu3 %v4236_v50 }
 0x1f7   : > { %2404 = vmatmul.bf16.gmra.mxu0 %v4274_v11 }
 0x1f8   : > { %v2187_v60 = vpop.f32.mrf.mxu2 }
 0x1f9   : > { %v2276_v63 = vpop.f32.mrf.mxu3  ;;  %v2188_v35 = vadd.f32 %v2187_v60, %v2099_v32  ;;  %v4835_v60 = vld [vmem:[#allocation30_spill] sm:$0xff] }
 0x1fa   : > { %v2100_v30 = vpop.f32.mrf.mxu1 }
 0x1fb   : > { %v2277_v46 = vadd.f32 %v2276_v63, %v2188_v35  ;;  %v2101_v54 = vadd.f32 %v2100_v30, %v4834_v55 }
 0x1fc   : > { %v2367_v36 = vpop.f32.mrf.mxu0 }
 0x1fd   : > { %v2366_v44 = vadd.f32 %v2365_v56, %v2277_v46 }
 0x1ff   : > { %v2482_v26 = vmul.f32 %v2366_v44, %v2366_v44 }
 0x200   : > { %v2189_v20 = vpop.f32.mrf.mxu2 }
 0x201   : > { %v2190_v48 = vadd.f32 %v2189_v20, %v2101_v54  ;;  %v2278_v10 = vpop.f32.mrf.mxu3  ;;  %v4836_v20 = vld [vmem:[#allocation31_spill] sm:$0xff] }
 0x202   : > { %v2103_v50 = vpop.f32.mrf.mxu1 }
 0x203   : > { %v2279_v38 = vadd.f32 %v2278_v10, %v2190_v48  ;;  %v2104_v63 = vadd.f32 %v2103_v50, %v4835_v60 }
 0x204   : > { %v2370_v40 = vpop.f32.mrf.mxu0 }
 0x205   : > { %v2368_v52 = vadd.f32 %v2367_v36, %v2279_v38  ;;  %2142 = vmatmul.bf16.gmra.mxu1 %v4274_v11  ;;  %2231 = vmatmul.bf16.gmra.mxu2 %v4288_v47 }
 0x206   : > { %2320 = vmatmul.bf16.gmra.mxu3 %v4277_v3 }
 0x207   : > { %2409 = vmatmul.bf16.gmra.mxu0 %v4329_v0  ;;  %v2445_v57 = vadd.f32 %v2368_v52, %v2366_v44  ;;  %v2483_v4 = vmul.f32 %v2368_v52, %v2368_v52  ;;  %v3234_v32 = vpack.c.bf16 %v2368_v52, %v2366_v44 }
 0x208   : > { %v2192_v56 = vpop.f32.mrf.mxu2 }
 0x209   : > { %v2514_v35 = vadd.f32 %v2483_v4, %v2482_v26  ;;  %3235 = vst [vmem:[%s4609_s11] sm:$0xff] %v3234_v32   ;;  %v2193_v30 = vadd.f32 %v2192_v56, %v2104_v63  ;;  %v2281_v11 = vpop.f32.mrf.mxu3  ;;  %v4837_v32 = vld [vmem:[#allocation34_spill] sm:$0xff]  ;;  %v4838_v56 = vld [vmem:[#allocation32_spill] sm:$0xff] }
 0x20a   : > { %v2105_v36 = vpop.f32.mrf.mxu1 }
 0x20b   : > { %v2282_v47 = vadd.f32 %v2281_v11, %v2193_v30  ;;  %v2106_v48 = vadd.f32 %v2105_v36, %v4836_v20 }
 0x20c   : > { %v2372_v46 = vpop.f32.mrf.mxu0 }
 0x20d   : > { %v2371_v55 = vadd.f32 %v2370_v40, %v2282_v47 }
 0x20f   : > { %v2446_v3 = vadd.f32 %v2445_v57, %v2371_v55  ;;  %v2484_v54 = vmul.f32 %v2371_v55, %v2371_v55 }
 0x210   : > { %v2194_v10 = vpop.f32.mrf.mxu2 }
 0x211   : > { %v2515_v44 = vadd.f32 %v2514_v35, %v2484_v54  ;;  %v2195_v38 = vadd.f32 %v2194_v10, %v2106_v48  ;;  %v2283_v50 = vpop.f32.mrf.mxu3 }
 0x212   : > { %v2108_v52 = vpop.f32.mrf.mxu1 }
 0x213   : > { %v2284_v26 = vadd.f32 %v2283_v50, %v2195_v38  ;;  %v2109_v35 = vadd.f32 %v2108_v52, %v4838_v56  ;;  %v4839_v38 = vld [vmem:[#allocation33_spill] sm:$0xff]  ;;  %v4841_v56 = vld [vmem:[#allocation35_spill] sm:$0xff] }
 0x214   : > { %v2375_v4 = vpop.f32.mrf.mxu0 }
 0x215   : > { %v2373_v60 = vadd.f32 %v2372_v46, %v2284_v26  ;;  %2147 = vmatmul.bf16.gmra.mxu1 %v4329_v0  ;;  %2236 = vmatmul.bf16.gmra.mxu2 %v4837_v32 }
 0x216   : > { %2325 = vmatmul.bf16.gmra.mxu3 %v4331_v12 }
 0x217   : > { %2414 = vmatmul.bf16.gmra.mxu0 %v4370_v17  ;;  %v2447_v40 = vadd.f32 %v2446_v3, %v2373_v60  ;;  %v2485_v57 = vmul.f32 %v2373_v60, %v2373_v60  ;;  %v3239_v63 = vpack.c.bf16 %v2373_v60, %v2371_v55 }
 0x218   : > { %v2197_v30 = vpop.f32.mrf.mxu2 }
 0x219   : > { %v2516_v11 = vadd.f32 %v2515_v44, %v2485_v57  ;;  %3311 = vst [vmem:[%s4609_s11 + $0x8] sm:$0xff] %v3239_v63   ;;  %v2198_v36 = vadd.f32 %v2197_v30, %v2109_v35  ;;  %v2286_v47 = vpop.f32.mrf.mxu3  ;;  %v4840_v57 = vld [vmem:[#allocation37_spill] sm:$0xff] }
 0x21a   : > { %v2110_v54 = vpop.f32.mrf.mxu1 }
 0x21b   : > { %v2287_v46 = vadd.f32 %v2286_v47, %v2198_v36  ;;  %v2111_v12 = vadd.f32 %v2110_v54, %v4839_v38 }
 0x21c   : > { %v2377_v20 = vpop.f32.mrf.mxu0 }
 0x21d   : > { %v2376_v0 = vadd.f32 %v2375_v4, %v2287_v46 }
 0x21f   : > { %v2448_v48 = vadd.f32 %v2447_v40, %v2376_v0  ;;  %v2486_v10 = vmul.f32 %v2376_v0, %v2376_v0 }
 0x220   : > { %v2199_v50 = vpop.f32.mrf.mxu2 }
 0x221   : > { %v2517_v26 = vadd.f32 %v2516_v11, %v2486_v10  ;;  %v2200_v3 = vadd.f32 %v2199_v50, %v2111_v12  ;;  %v2288_v55 = vpop.f32.mrf.mxu3  ;;  %v4842_v12 = vld [vmem:[#allocation36_spill] sm:$0xff] }
 0x222   : > { %v2113_v60 = vpop.f32.mrf.mxu1 }
 0x223   : > { %v2289_v52 = vadd.f32 %v2288_v55, %v2200_v3  ;;  %v2114_v35 = vadd.f32 %v2113_v60, %v4841_v56 }
 0x224   : > { %v2380_v32 = vpop.f32.mrf.mxu0 }
 0x225   : > { %v2378_v44 = vadd.f32 %v2377_v20, %v2289_v52  ;;  %2152 = vmatmul.bf16.gmra.mxu1 %v4370_v17  ;;  %2241 = vmatmul.bf16.gmra.mxu2 %v4840_v57 }
 0x226   : > { %2330 = vmatmul.bf16.gmra.mxu3 %v4374_v34 }
 0x227   : > { %2419 = vmatmul.bf16.gmra.mxu0 %v4424_v51  ;;  %v2449_v4 = vadd.f32 %v2448_v48, %v2378_v44  ;;  %v2487_v40 = vmul.f32 %v2378_v44, %v2378_v44  ;;  %v3244_v63 = vpack.c.bf16 %v2378_v44, %v2376_v0 }
 0x228   : > { %v2202_v30 = vpop.f32.mrf.mxu2 }
 0x229   : > { %v2518_v11 = vadd.f32 %v2517_v26, %v2487_v40  ;;  %3312 = vst [vmem:[%s4609_s11 + $0x10] sm:$0xff] %v3244_v63   ;;  %v2203_v36 = vadd.f32 %v2202_v30, %v2114_v35  ;;  %v2291_v47 = vpop.f32.mrf.mxu3 }
 0x22a   : > { %v2115_v54 = vpop.f32.mrf.mxu1 }
 0x22b   : > { %v2292_v46 = vadd.f32 %v2291_v47, %v2203_v36  ;;  %v2116_v34 = vadd.f32 %v2115_v54, %v4842_v12  ;;  %v4843_v54 = vld [vmem:[#allocation38_spill] sm:$0xff] }
 0x22c   : > { %v2382_v20 = vpop.f32.mrf.mxu0 }
 0x22d   : > { %v2381_v17 = vadd.f32 %v2380_v32, %v2292_v46 }
 0x22f   : > { %v2450_v10 = vadd.f32 %v2449_v4, %v2381_v17  ;;  %v2488_v38 = vmul.f32 %v2381_v17, %v2381_v17 }
 0x230   : > { %v2204_v50 = vpop.f32.mrf.mxu2 }
 0x231   : > { %v2519_v3 = vadd.f32 %v2518_v11, %v2488_v38  ;;  %v2205_v48 = vadd.f32 %v2204_v50, %v2116_v34  ;;  %v2293_v0 = vpop.f32.mrf.mxu3 }
 0x232   : > { %v2118_v55 = vpop.f32.mrf.mxu1 }
 0x233   : > { %v2294_v60 = vadd.f32 %v2293_v0, %v2205_v48  ;;  %v2119_v4 = vadd.f32 %v2118_v55, %v4418_v33  ;;  %v813_v33 = vrot.slane %v4446_v45, 5  ;;  %v816_v55 = vrot.slane %v4464_v42, 5 }
 0x234   : > { %v2385_v52 = vpop.f32.mrf.mxu0 }
 0x235   : > { %v2383_v26 = vadd.f32 %v2382_v20, %v2294_v60  ;;  %2157 = vmatmul.bf16.gmra.mxu1 %v4424_v51  ;;  %2246 = vmatmul.bf16.gmra.mxu2 %v4436_v8  ;;  %v815_v0 = vrot.slane %v813_v33, 4  ;;  %v4642_v60 = vld [vmem:[%s3606_s26 + $0xcc] sm:$0xf] }
 0x236   : > { %2335 = vmatmul.bf16.gmra.mxu3 %v4427_v23 }
 0x237   : > { %2424 = vmatmul.bf16.gmra.mxu0 %v4466_v15  ;;  %v2451_v32 = vadd.f32 %v2450_v10, %v2383_v26  ;;  %v2489_v44 = vmul.f32 %v2383_v26, %v2383_v26  ;;  %v3249_v57 = vpack.c.bf16 %v2383_v26, %v2381_v17 }
 0x238   : > { %v2207_v40 = vpop.f32.mrf.mxu2 }
 0x239   : > { %v2520_v63 = vadd.f32 %v2519_v3, %v2489_v44  ;;  %3313 = vst [vmem:[%s4609_s11 + $0x18] sm:$0xff] %v3249_v57   ;;  %v2208_v56 = vadd.f32 %v2207_v40, %v2119_v4  ;;  %v2296_v35 = vpop.f32.mrf.mxu3  ;;  %v4844_v3 = vld [vmem:[#allocation39_spill] sm:$0xff]  ;;  %v4646_v44 = vld [vmem:[%s3606_s26 + $0xd0] sm:$0xf]  ;;  %v819_v4 = vshrl.u32 %v4642_v60, 16  ;;  %v822_v40 = vshll.u32 %v4642_v60, 16 }
 0x23a   : > { %v2120_v30 = vpop.f32.mrf.mxu1  ;;  %v2771_v48 = vrot.slane %v4844_v3, 9 }
 0x23b   : > { %v2297_v11 = vadd.f32 %v2296_v35, %v2208_v56  ;;  %v2121_v23 = vadd.f32 %v2120_v30, %v4843_v54  ;;  %v832_v56 = vshrl.u32 %v4646_v44, 16 }
 0x23c   : > { %v2387_v36 = vpop.f32.mrf.mxu0 }
 0x23d   : > { %v2386_v51 = vadd.f32 %v2385_v52, %v2297_v11  ;;  %v817_v11 = vsel %vm3789_vm5, %v815_v0, %v816_v55  ;;  %v847_v55 = vrot.slane %v4646_v44, 5 }
 0x23e   : > { %v1053_v54 = vunpack.c.l.b16 %v817_v11 }
 0x23f   : > { %v2452_v47 = vadd.f32 %v2451_v32, %v2386_v51  ;;  %v2490_v8 = vmul.f32 %v2386_v51, %v2386_v51 }
 0x240   : > { %v2209_v46 = vpop.f32.mrf.mxu2 }
 0x241   : > { %v2521_v20 = vadd.f32 %v2520_v63, %v2490_v8  ;;  %v2210_v10 = vadd.f32 %v2209_v46, %v2121_v23  ;;  %v2298_v17 = vpop.f32.mrf.mxu3  ;;  %v828_v63 = vshll.u32 %v4646_v44, 16  ;;  %v233_v23 = vld [vmem:[%s3606_s26 + $0xd4] sm:$0x1] }
 0x242   : > { %v2123_v38 = vpop.f32.mrf.mxu1 }
 0x243   : > { %v2299_v12 = vadd.f32 %v2298_v17, %v2210_v10  ;;  %v2124_v32 = vadd.f32 %v2123_v38, %v4460_v16  ;;  %v814_v16 = vsel %vm3789_vm5, %v2771_v48, %v813_v33  ;;  %v830_v46 = vrot.slane %v828_v63, 5 }
 0x244   : > { %v2390_v34 = vpop.f32.mrf.mxu0  ;;  %v1052_v8 = vunpack.c.l.b16 %v814_v16  ;;  %v838_v48 = vshll.u32 %v233_v23, 16 }
 0x245   : > { %v2388_v50 = vadd.f32 %v2387_v36, %v2299_v12  ;;  %2162 = vmatmul.bf16.gmra.mxu1 %v4466_v15  ;;  %2251 = vmatmul.bf16.gmra.mxu2 %v4477_v19 }
 0x246   : > { %2340 = vmatmul.bf16.gmra.mxu3 %v4468_v6  ;;  %v1054_v0 = vpack.c.b16 %v1053_v54, %v1052_v8 }
 0x247   : > { %2429 = vmatmul.bf16.gmra.mxu0 %v4495_v9  ;;  %v2453_v45 = vadd.f32 %v2452_v47, %v2388_v50  ;;  %v2491_v52 = vmul.f32 %v2388_v50, %v2388_v50  ;;  %v3254_v26 = vpack.c.bf16 %v2388_v50, %v2386_v51  ;;  %v821_v51 = vrot.slane %v819_v4, 4 }
 0x248   : > { %v2212_v15 = vpop.f32.mrf.mxu2  ;;  %v824_v47 = vrot.slane %v822_v40, 5  ;;  %v849_v4 = vrot.slane %v847_v55, 4  ;;  %v850_v40 = vrot.slane %v233_v23, 5 }
 0x249   : > { %v2522_v19 = vadd.f32 %v2521_v20, %v2491_v52  ;;  %3314 = vst [vmem:[%s4609_s11 + $0x20] sm:$0xff] %v3254_v26   ;;  %v2213_v6 = vadd.f32 %v2212_v15, %v2124_v32  ;;  %v2301_v57 = vpop.f32.mrf.mxu3  ;;  %v834_v20 = vrot.slane %v832_v56, 4 }
 0x24a   : > { %v2125_v42 = vpop.f32.mrf.mxu1  ;;  %v825_v33 = vor.u32 %v824_v47, %v821_v51 }
 0x24b   : > { %v2302_v35 = vadd.f32 %v2301_v57, %v2213_v6  ;;  %v2126_v38 = vadd.f32 %v2125_v42, %v4474_v59  ;;  %v2772_v57 = vrot.slane %v4642_v60, 9 }
 0x24c   : > { %v2392_v30 = vpop.f32.mrf.mxu0  ;;  %v826_v59 = vrot.slane %v825_v33, 4 }
 0x24d   : > { %v2391_v36 = vadd.f32 %v2390_v34, %v2302_v35  ;;  %v835_v34 = vor.u32 %v834_v20, %v830_v46 }
 0x24f   : > { %v2454_v10 = vadd.f32 %v2453_v45, %v2391_v36  ;;  %v2492_v17 = vmul.f32 %v2391_v36, %v2391_v36  ;;  %v840_v45 = vrot.slane %v838_v48, 5 }
 0x250   : > { %v2214_v12 = vpop.f32.mrf.mxu2 }
 0x251   : > { %v2523_v50 = vadd.f32 %v2522_v19, %v2492_v17  ;;  %v2215_v3 = vadd.f32 %v2214_v12, %v2126_v38  ;;  %v2303_v52 = vpop.f32.mrf.mxu3  ;;  %v836_v19 = vrot.slane %v835_v34, 4 }
 0x252   : > { %v2128_v26 = vpop.f32.mrf.mxu1 }
 0x253   : > { %v2304_v32 = vadd.f32 %v2303_v52, %v2215_v3  ;;  %v2129_v56 = vadd.f32 %v2128_v26, %v4492_v18  ;;  %v841_v60 = vsel %vm3784_vm4, %v836_v19, %v840_v45  ;;  %v851_v18 = vsel %vm3789_vm5, %v849_v4, %v850_v40  ;;  %v3157_v3 = vld [vmem:[%s3606_s26 + $0xcc] sm:$0xff]  ;;  %s3230_s26 = sshll.u32 %s3550_s16, 7 }
 0x254   : > { %v2395_v15 = vpop.f32.mrf.mxu0  ;;  %v1061_v54 = vunpack.c.l.b16 %v841_v60  ;;  %v1065_v20 = vunpack.c.l.b16 %v851_v18  ;;  %s2635_s20 = scalar_lea.hbm %s4755_s2, %s3230_s26 }
 0x255   : > { %v2393_v6 = vadd.f32 %v2392_v30, %v2304_v32  ;;  %2167 = vmatmul.bf16.gmra.mxu1 %v4495_v9  ;;  %2256 = vmatmul.bf16.gmra.mxu2 %v4498_v31  ;;  %s2638_s25 = sshll.u32 %s2635_s20, 4  ;;  %s2639_s25 = int_to_ptr.hbm [resolvable:$true] %s2638_s25 }
 0x256   : > { %2345 = vmatmul.bf16.gmra.mxu3 %v4500_v58  ;;  %v831_v58 = vsel %vm3784_vm4, %v826_v59, %v830_v46  ;;  %s3425_s28 = sshra.s32 %s2639_s25, 4  ;;  %s3426_s28 = int_to_ptr.hbm [resolvable:$true] %s3425_s28 }
 0x257   : > { %2434 = vmatmul.bf16.gmra.mxu0 %v1054_v0  ;;  %v2455_v42 = vadd.f32 %v2454_v10, %v2393_v6  ;;  %v2493_v44 = vmul.f32 %v2393_v6, %v2393_v6  ;;  %v3259_v63 = vpack.c.bf16 %v2393_v6, %v2391_v36  ;;  %v848_v36 = vsel %vm3789_vm5, %v2772_v57, %v847_v55  ;;  %s3427_s29 = scalar_lea.hbm %s3426_s28, 128  ;;  %p3432_p0 = scmp.lt.s32.totalorder %s3426_s28, %s4755_s2 }
 0x258   : > { %v2217_v35 = vpop.f32.mrf.mxu2  ;;  %v1060_v8 = vunpack.c.l.b16 %v831_v58  ;;  %v1064_v23 = vunpack.c.l.b16 %v848_v36  ;;  %p3428_p11 = scmp.ne.s32.totalorder %s3426_s28, %s3427_s29  ;;  %p3433_p1 = scmp.lt.s32.totalorder %s3431_s5, %s3427_s29 }
 0x259   : > { %v2524_v9 = vadd.f32 %v2523_v50, %v2493_v44  ;;  %3315 = vst [vmem:[%s4609_s11 + $0x28] sm:$0xff] %v3259_v63   ;;  %v2218_v30 = vadd.f32 %v2217_v35, %v2129_v56  ;;  %v2306_v31 = vpop.f32.mrf.mxu3 }
 0x25a   : > { %v2130_v16 = vpop.f32.mrf.mxu1  ;;  %v1062_v33 = vpack.c.b16 %v1061_v54, %v1060_v8  ;;  %v1066_v48 = vpack.c.b16 %v1065_v20, %v1064_v23  ;;  %p3429_p12 = pnand %p3428_p11, %p3567_p5  ;;  %p3434_p2 = por %p3433_p1, %p3432_p0 }
 0x25b   : > { %v2307_v11 = vadd.f32 %v2306_v31, %v2218_v30  ;;  %v2131_v46 = vadd.f32 %v2130_v16, %v4504_v27 }
 0x25c   : > { %v2397_v51 = vpop.f32.mrf.mxu0  ;;  %p3430_p13 = pneg %p3429_p12 }
 0x25d   : > { %v2396_v47 = vadd.f32 %v2395_v15, %v2307_v11 }
 0x25e   : > { %p3435_p3 = pnand %p3434_p2, %p3430_p13 }
 0x25f   : > { %v2456_v10 = vadd.f32 %v2455_v42, %v2396_v47  ;;  %v2494_v17 = vmul.f32 %v2396_v47, %v2396_v47 }
 0x260   : > { %v2219_v38 = vpop.f32.mrf.mxu2 }
 0x261   : > { %v2525_v12 = vadd.f32 %v2524_v9, %v2494_v17  ;;  %v2220_v29 = vadd.f32 %v2219_v38, %v2131_v46  ;;  %v2308_v50 = vpop.f32.mrf.mxu3 }
 0x262   : > { %v2133_v52 = vpop.f32.mrf.mxu1 }
 0x263   : > { %v2309_v37 = vadd.f32 %v2308_v50, %v2220_v29  ;;  %v2134_v27 = vadd.f32 %v2133_v52, %v4509_v22 }
 0x264   : > { %v2400_v26 = vpop.f32.mrf.mxu0 }
 0x265   : > { %v2398_v34 = vadd.f32 %v2397_v51, %v2309_v37  ;;  %2172 = vmatmul.bf16.gmra.mxu1 %v1054_v0  ;;  %2261 = vmatmul.bf16.gmra.mxu2 %v3157_v3 }
 0x266   : > { %2350 = vmatmul.bf16.gmra.mxu3 %v1062_v33 }
 0x267   : > { %2439 = vmatmul.bf16.gmra.mxu0 %v1066_v48  ;;  %v2457_v55 = vadd.f32 %v2456_v10, %v2398_v34  ;;  %v2495_v32 = vmul.f32 %v2398_v34, %v2398_v34  ;;  %v3264_v15 = vpack.c.bf16 %v2398_v34, %v2396_v47 }
 0x268   : > { %v2222_v6 = vpop.f32.mrf.mxu2 }
 0x269   : > { %v2526_v59 = vadd.f32 %v2525_v12, %v2495_v32  ;;  %3316 = vst [vmem:[%s4609_s11 + $0x30] sm:$0xff] %v3264_v15   ;;  %v2223_v45 = vadd.f32 %v2222_v6, %v2134_v27  ;;  %v2311_v19 = vpop.f32.mrf.mxu3 }
 0x26a   : > { %v2135_v57 = vpop.f32.mrf.mxu1 }
 0x26b   : > { %v2312_v4 = vadd.f32 %v2311_v19, %v2223_v45  ;;  %v2136_v0 = vadd.f32 %v2135_v57, %v4514_v39 }
 0x26c   : > { %v2402_v40 = vpop.f32.mrf.mxu0 }
 0x26d   : > { %v2401_v42 = vadd.f32 %v2400_v26, %v2312_v4 }
 0x26f   : > { %v2458_v44 = vadd.f32 %v2457_v55, %v2401_v42  ;;  %v2496_v63 = vmul.f32 %v2401_v42, %v2401_v42 }
 0x270   : > { %v2224_v56 = vpop.f32.mrf.mxu2 }
 0x271   : > { %v2527_v35 = vadd.f32 %v2526_v59, %v2496_v63  ;;  %v2225_v9 = vadd.f32 %v2224_v56, %v2136_v0  ;;  %v2313_v30 = vpop.f32.mrf.mxu3 }
 0x272   : > { %v2138_v31 = vpop.f32.mrf.mxu1 }
 0x273   : > { %v2314_v22 = vadd.f32 %v2313_v30, %v2225_v9  ;;  %v2139_v36 = vadd.f32 %v2138_v31, %v4519_v7 }
 0x274   : > { %v2405_v16 = vpop.f32.mrf.mxu0 }
 0x275   : > { %v2403_v58 = vadd.f32 %v2402_v40, %v2314_v22 }
 0x277   : > { %v2459_v11 = vadd.f32 %v2458_v44, %v2403_v58  ;;  %v2497_v51 = vmul.f32 %v2403_v58, %v2403_v58  ;;  %v3269_v60 = vpack.c.bf16 %v2403_v58, %v2401_v42 }
 0x278   : > { %v2227_v18 = vpop.f32.mrf.mxu2 }
 0x279   : > { %v2528_v47 = vadd.f32 %v2527_v35, %v2497_v51  ;;  %3317 = vst [vmem:[%s4609_s11 + $0x38] sm:$0xff] %v3269_v60   ;;  %v2228_v8 = vadd.f32 %v2227_v18, %v2139_v36  ;;  %v2316_v54 = vpop.f32.mrf.mxu3 }
 0x27a   : > { %v2140_v23 = vpop.f32.mrf.mxu1 }
 0x27b   : > { %v2317_v39 = vadd.f32 %v2316_v54, %v2228_v8  ;;  %v2141_v38 = vadd.f32 %v2140_v23, %v4524_v25 }
 0x27c   : > { %v2407_v20 = vpop.f32.mrf.mxu0 }
 0x27d   : > { %v2406_v10 = vadd.f32 %v2405_v16, %v2317_v39 }
 0x27f   : > { %v2460_v17 = vadd.f32 %v2459_v11, %v2406_v10  ;;  %v2498_v46 = vmul.f32 %v2406_v10, %v2406_v10 }
 0x280   : > { %v2229_v12 = vpop.f32.mrf.mxu2 }
 0x281   : > { %v2529_v29 = vadd.f32 %v2528_v47, %v2498_v46  ;;  %v2230_v50 = vadd.f32 %v2229_v12, %v2141_v38  ;;  %v2318_v3 = vpop.f32.mrf.mxu3 }
 0x282   : > { %v2143_v52 = vpop.f32.mrf.mxu1 }
 0x283   : > { %v2319_v7 = vadd.f32 %v2318_v3, %v2230_v50  ;;  %v2144_v55 = vadd.f32 %v2143_v52, %v4529_v1 }
 0x284   : > { %v2410_v33 = vpop.f32.mrf.mxu0 }
 0x285   : > { %v2408_v48 = vadd.f32 %v2407_v20, %v2319_v7 }
 0x287   : > { %v2461_v37 = vadd.f32 %v2460_v17, %v2408_v48  ;;  %v2499_v26 = vmul.f32 %v2408_v48, %v2408_v48  ;;  %v3274_v34 = vpack.c.bf16 %v2408_v48, %v2406_v10 }
 0x288   : > { %v2232_v32 = vpop.f32.mrf.mxu2 }
 0x289   : > { %v2530_v15 = vadd.f32 %v2529_v29, %v2499_v26  ;;  %3318 = vst [vmem:[%s4609_s11 + $0x40] sm:$0xff] %v3274_v34   ;;  %v2233_v27 = vadd.f32 %v2232_v32, %v2144_v55  ;;  %v2321_v6 = vpop.f32.mrf.mxu3 }
 0x28a   : > { %v2145_v59 = vpop.f32.mrf.mxu1 }
 0x28b   : > { %v2322_v25 = vadd.f32 %v2321_v6, %v2233_v27  ;;  %v2146_v40 = vadd.f32 %v2145_v59, %v4534_v5 }
 0x28c   : > { %v2412_v45 = vpop.f32.mrf.mxu0 }
 0x28d   : > { %v2411_v19 = vadd.f32 %v2410_v33, %v2322_v25 }
 0x28f   : > { %v2462_v57 = vadd.f32 %v2461_v37, %v2411_v19  ;;  %v2500_v4 = vmul.f32 %v2411_v19, %v2411_v19 }
 0x290   : > { %v2234_v42 = vpop.f32.mrf.mxu2 }
 0x291   : > { %v2531_v44 = vadd.f32 %v2530_v15, %v2500_v4  ;;  %v2235_v63 = vadd.f32 %v2234_v42, %v2146_v40  ;;  %v2323_v0 = vpop.f32.mrf.mxu3 }
 0x292   : > { %v2148_v56 = vpop.f32.mrf.mxu1 }
 0x293   : > { %v2324_v1 = vadd.f32 %v2323_v0, %v2235_v63  ;;  %v2149_v16 = vadd.f32 %v2148_v56, %v4539_v14 }
 0x294   : > { %v2415_v35 = vpop.f32.mrf.mxu0 }
 0x295   : > { %v2413_v9 = vadd.f32 %v2412_v45, %v2324_v1 }
 0x297   : > { %v2463_v30 = vadd.f32 %v2462_v57, %v2413_v9  ;;  %v2501_v31 = vmul.f32 %v2413_v9, %v2413_v9  ;;  %v3279_v22 = vpack.c.bf16 %v2413_v9, %v2411_v19 }
 0x298   : > { %v2237_v58 = vpop.f32.mrf.mxu2 }
 0x299   : > { %v2532_v11 = vadd.f32 %v2531_v44, %v2501_v31  ;;  %3319 = vst [vmem:[%s4609_s11 + $0x48] sm:$0xff] %v3279_v22   ;;  %v2238_v51 = vadd.f32 %v2237_v58, %v2149_v16  ;;  %v2326_v60 = vpop.f32.mrf.mxu3 }
 0x29a   : > { %v2150_v36 = vpop.f32.mrf.mxu1 }
 0x29b   : > { %v2327_v5 = vadd.f32 %v2326_v60, %v2238_v51  ;;  %v2151_v23 = vadd.f32 %v2150_v36, %v4544_v13 }
 0x29c   : > { %v2417_v18 = vpop.f32.mrf.mxu0 }
 0x29d   : > { %v2416_v47 = vadd.f32 %v2415_v35, %v2327_v5 }
 0x29f   : > { %v2464_v8 = vadd.f32 %v2463_v30, %v2416_v47  ;;  %v2502_v54 = vmul.f32 %v2416_v47, %v2416_v47 }
 0x2a0   : > { %v2239_v39 = vpop.f32.mrf.mxu2 }
 0x2a1   : > { %v2533_v20 = vadd.f32 %v2532_v11, %v2502_v54  ;;  %v2240_v10 = vadd.f32 %v2239_v39, %v2151_v23  ;;  %v2328_v17 = vpop.f32.mrf.mxu3 }
 0x2a2   : > { %v2153_v46 = vpop.f32.mrf.mxu1 }
 0x2a3   : > { %v2329_v14 = vadd.f32 %v2328_v17, %v2240_v10  ;;  %v2154_v52 = vadd.f32 %v2153_v46, %v4549_v53 }
 0x2a4   : > { %v2420_v38 = vpop.f32.mrf.mxu0 }
 0x2a5   : > { %v2418_v12 = vadd.f32 %v2417_v18, %v2329_v14 }
 0x2a7   : > { %v2465_v29 = vadd.f32 %v2464_v8, %v2418_v12  ;;  %v2503_v50 = vmul.f32 %v2418_v12, %v2418_v12  ;;  %v3284_v3 = vpack.c.bf16 %v2418_v12, %v2416_v47 }
 0x2a8   : > { %v2242_v7 = vpop.f32.mrf.mxu2 }
 0x2a9   : > { %v2534_v33 = vadd.f32 %v2533_v20, %v2503_v50  ;;  %3320 = vst [vmem:[%s4609_s11 + $0x50] sm:$0xff] %v3284_v3   ;;  %v2243_v48 = vadd.f32 %v2242_v7, %v2154_v52  ;;  %v2331_v37 = vpop.f32.mrf.mxu3 }
 0x2aa   : > { %v2155_v26 = vpop.f32.mrf.mxu1 }
 0x2ab   : > { %v2332_v13 = vadd.f32 %v2331_v37, %v2243_v48  ;;  %v2156_v27 = vadd.f32 %v2155_v26, %v4554_v61 }
 0x2ac   : > { %v2422_v34 = vpop.f32.mrf.mxu0 }
 0x2ad   : > { %v2421_v55 = vadd.f32 %v2420_v38, %v2332_v13 }
 0x2af   : > { %v2466_v32 = vadd.f32 %v2465_v29, %v2421_v55  ;;  %v2504_v15 = vmul.f32 %v2421_v55, %v2421_v55 }
 0x2b0   : > { %v2244_v6 = vpop.f32.mrf.mxu2 }
 0x2b1   : > { %v2535_v59 = vadd.f32 %v2534_v33, %v2504_v15  ;;  %v2245_v25 = vadd.f32 %v2244_v6, %v2156_v27  ;;  %v2333_v45 = vpop.f32.mrf.mxu3 }
 0x2b2   : > { %v2158_v19 = vpop.f32.mrf.mxu1 }
 0x2b3   : > { %v2334_v53 = vadd.f32 %v2333_v45, %v2245_v25  ;;  %v2159_v63 = vadd.f32 %v2158_v19, %v4559_v2 }
 0x2b4   : > { %v2425_v57 = vpop.f32.mrf.mxu0 }
 0x2b5   : > { %v2423_v4 = vadd.f32 %v2422_v34, %v2334_v53 }
 0x2b7   : > { %v2467_v40 = vadd.f32 %v2466_v32, %v2423_v4  ;;  %v2505_v42 = vmul.f32 %v2423_v4, %v2423_v4  ;;  %v3289_v44 = vpack.c.bf16 %v2423_v4, %v2421_v55 }
 0x2b8   : > { %v2247_v0 = vpop.f32.mrf.mxu2 }
 0x2b9   : > { %v2536_v56 = vadd.f32 %v2535_v59, %v2505_v42  ;;  %3321 = vst [vmem:[%s4609_s11 + $0x58] sm:$0xff] %v3289_v44   ;;  %v2248_v1 = vadd.f32 %v2247_v0, %v2159_v63  ;;  %v2336_v35 = vpop.f32.mrf.mxu3 }
 0x2ba   : > { %v2160_v9 = vpop.f32.mrf.mxu1 }
 0x2bb   : > { %v2337_v61 = vadd.f32 %v2336_v35, %v2248_v1  ;;  %v2161_v58 = vadd.f32 %v2160_v9, %v4564_v21 }
 0x2bc   : > { %v2427_v30 = vpop.f32.mrf.mxu0 }
 0x2bd   : > { %v2426_v31 = vadd.f32 %v2425_v57, %v2337_v61 }
 0x2bf   : > { %v2468_v22 = vadd.f32 %v2467_v40, %v2426_v31  ;;  %v2506_v16 = vmul.f32 %v2426_v31, %v2426_v31 }
 0x2c0   : > { %v2249_v11 = vpop.f32.mrf.mxu2 }
 0x2c1   : > { %v2537_v51 = vadd.f32 %v2536_v56, %v2506_v16  ;;  %v2250_v60 = vadd.f32 %v2249_v11, %v2161_v58  ;;  %v2338_v36 = vpop.f32.mrf.mxu3 }
 0x2c2   : > { %v2163_v5 = vpop.f32.mrf.mxu1 }
 0x2c3   : > { %v2339_v2 = vadd.f32 %v2338_v36, %v2250_v60  ;;  %v2164_v39 = vadd.f32 %v2163_v5, %v4569_v28 }
 0x2c4   : > { %v2430_v18 = vpop.f32.mrf.mxu0 }
 0x2c5   : > { %v2428_v47 = vadd.f32 %v2427_v30, %v2339_v2 }
 0x2c7   : > { %v2469_v8 = vadd.f32 %v2468_v22, %v2428_v47  ;;  %v2507_v54 = vmul.f32 %v2428_v47, %v2428_v47  ;;  %v3294_v23 = vpack.c.bf16 %v2428_v47, %v2426_v31 }
 0x2c8   : > { %v2252_v20 = vpop.f32.mrf.mxu2 }
 0x2c9   : > { %v2538_v10 = vadd.f32 %v2537_v51, %v2507_v54  ;;  %3322 = vst [vmem:[%s4609_s11 + $0x60] sm:$0xff] %v3294_v23   ;;  %v2253_v17 = vadd.f32 %v2252_v20, %v2164_v39  ;;  %v2341_v46 = vpop.f32.mrf.mxu3 }
 0x2ca   : > { %v2165_v14 = vpop.f32.mrf.mxu1 }
 0x2cb   : > { %v2342_v21 = vadd.f32 %v2341_v46, %v2253_v17  ;;  %v2166_v3 = vadd.f32 %v2165_v14, %v4574_v43 }
 0x2cc   : > { %v2432_v38 = vpop.f32.mrf.mxu0 }
 0x2cd   : > { %v2431_v12 = vadd.f32 %v2430_v18, %v2342_v21 }
 0x2cf   : > { %v2470_v29 = vadd.f32 %v2469_v8, %v2431_v12  ;;  %v2508_v50 = vmul.f32 %v2431_v12, %v2431_v12 }
 0x2d0   : > { %v2254_v52 = vpop.f32.mrf.mxu2 }
 0x2d1   : > { %v2539_v7 = vadd.f32 %v2538_v10, %v2508_v50  ;;  %v2255_v33 = vadd.f32 %v2254_v52, %v2166_v3  ;;  %v2343_v48 = vpop.f32.mrf.mxu3 }
 0x2d2   : > { %v2168_v37 = vpop.f32.mrf.mxu1 }
 0x2d3   : > { %v2344_v28 = vadd.f32 %v2343_v48, %v2255_v33  ;;  %v2169_v15 = vadd.f32 %v2168_v37, %v4579_v49 }
 0x2d4   : > { %v2435_v13 = vpop.f32.mrf.mxu0 }
 0x2d5   : > { %v2433_v26 = vadd.f32 %v2432_v38, %v2344_v28 }
 0x2d7   : > { %v2471_v34 = vadd.f32 %v2470_v29, %v2433_v26  ;;  %v2509_v55 = vmul.f32 %v2433_v26, %v2433_v26  ;;  %v3299_v32 = vpack.c.bf16 %v2433_v26, %v2431_v12 }
 0x2d8   : > { %v2257_v27 = vpop.f32.mrf.mxu2 }
 0x2d9   : > { %v2540_v6 = vadd.f32 %v2539_v7, %v2509_v55  ;;  %3323 = vst [vmem:[%s4609_s11 + $0x68] sm:$0xff] %v3299_v32   ;;  %v2258_v59 = vadd.f32 %v2257_v27, %v2169_v15  ;;  %v2346_v25 = vpop.f32.mrf.mxu3 }
 0x2da   : > { %v2170_v45 = vpop.f32.mrf.mxu1 }
 0x2db   : > { %v2347_v43 = vadd.f32 %v2346_v25, %v2258_v59  ;;  %v2171_v4 = vadd.f32 %v2170_v45, %v4584_v24 }
 0x2dc   : > { %v2437_v40 = vpop.f32.mrf.mxu0 }
 0x2dd   : > { %v2436_v19 = vadd.f32 %v2435_v13, %v2347_v43 }
 0x2df   : > { %v2472_v53 = vadd.f32 %v2471_v34, %v2436_v19  ;;  %v2510_v57 = vmul.f32 %v2436_v19, %v2436_v19 }
 0x2e0   : > { %v2259_v42 = vpop.f32.mrf.mxu2 }
 0x2e1   : > { %v2541_v44 = vadd.f32 %v2540_v6, %v2510_v57  ;;  %v2260_v63 = vadd.f32 %v2259_v42, %v2171_v4  ;;  %v2348_v0 = vpop.f32.mrf.mxu3 }
 0x2e2   : > { %v2173_v56 = vpop.f32.mrf.mxu1 }
 0x2e3   : > { %v2349_v49 = vadd.f32 %v2348_v0, %v2260_v63  ;;  %v2174_v30 = vadd.f32 %v2173_v56, %v4589_v41 }
 0x2e4   : > { %v2440_v58 = vpop.f32.mrf.mxu0 }
 0x2e5   : > { %v2438_v1 = vadd.f32 %v2437_v40, %v2349_v49 }
 0x2e7   : > { %v2473_v35 = vadd.f32 %v2472_v53, %v2438_v1  ;;  %v2511_v9 = vmul.f32 %v2438_v1, %v2438_v1  ;;  %v3304_v61 = vpack.c.bf16 %v2438_v1, %v2436_v19 }
 0x2e8   : > { %v2262_v31 = vpop.f32.mrf.mxu2 }
 0x2e9   : > { %v2542_v22 = vadd.f32 %v2541_v44, %v2511_v9  ;;  %3324 = vst [vmem:[%s4609_s11 + $0x70] sm:$0xff] %v3304_v61   ;;  %v2263_v16 = vadd.f32 %v2262_v31, %v2174_v30  ;;  %v2351_v24 = vpop.f32.mrf.mxu3 }
 0x2ea   : > { %v2175_v51 = vpop.f32.mrf.mxu1 }
 0x2eb   : > { %v2352_v11 = vadd.f32 %v2351_v24, %v2263_v16  ;;  %v2176_v2 = vadd.f32 %v2175_v51, %v4594_v62 }
 0x2ec   : > { %v2442_v23 = vpop.f32.mrf.mxu0 }
 0x2ed   : > { %v2441_v60 = vadd.f32 %v2440_v58, %v2352_v11 }
 0x2ef   : > { %v2474_v36 = vadd.f32 %v2473_v35, %v2441_v60  ;;  %v2512_v5 = vmul.f32 %v2441_v60, %v2441_v60 }
 0x2f0   : > { %v2264_v18 = vpop.f32.mrf.mxu2 }
 0x2f1   : > { %v2543_v47 = vadd.f32 %v2542_v22, %v2512_v5  ;;  %v2265_v8 = vadd.f32 %v2264_v18, %v2176_v2  ;;  %v2353_v41 = vpop.f32.mrf.mxu3 }
 0x2f3   : > { %v2354_v54 = vadd.f32 %v2353_v41, %v2265_v8 }
 0x2f5   : > { %v2443_v39 = vadd.f32 %v2442_v23, %v2354_v54 }
 0x2f7   : > { %v2475_v20 = vadd.f32 %v2474_v36, %v2443_v39  ;;  %v2513_v10 = vmul.f32 %v2443_v39, %v2443_v39  ;;  %v3309_v62 = vpack.c.bf16 %v2443_v39, %v2441_v60 }
 0x2f9   : > { %v2476_v17 = vrot.slane %v2475_v20, 4  ;;  %v2544_v46 = vadd.f32 %v2543_v47, %v2513_v10  ;;  %3325 = vst [vmem:[%s4609_s11 + $0x78] sm:$0xff] %v3309_v62  }
 0x2fa   : > { %3438 = shalt.err (!%p3435_p3)
}
 0x2fb   : > { %s3507_s8 = smov 64   ;;  %s3508_s10 = smov 4   ;;  %v2477_v14 = vadd.f32 %v2476_v17, %v2475_v20  ;;  %v2545_v21 = vrot.slane %v2544_v46, 4  ;;  %vm2551_vm6 = vcmask 1040384  }
 0x2fc   : > { %3351 = dma.vmem_to_hbm [thread:$0]  (%p3567_p5), %s2637_s24, 2048, %s2639_s25, %s2619_s27, %s3507_s8, %s3507_s8, %s3508_s10  }
 0x2fd   : > { %v2478_v38 = vrot.slane %v2477_v14, 2  ;;  %v2546_v12 = vadd.f32 %v2545_v21, %v2544_v46  ;;  %s2753_s11 = sshll.u32 %s4601_s9, 1  ;;  %s3137_s26 = sshll.u32 %s3550_s16, 1 }
 0x2fe   : > { %s2651_s20 = scalar_lea.hbm %s4756_s3, %s3137_s26  ;;  %s174_s28 = scalar_lea.vmem [#allocation4], %s2753_s11 }
 0x2ff   : > { %v2479_v29 = vadd.f32 %v2478_v38, %v2477_v14  ;;  %v2547_v50 = vrot.slane %v2546_v12, 2  ;;  %s2653_s29 = sshll.u32 %s174_s28, 4  ;;  %s2655_s24 = sshll.u32 %s2651_s20, 4  ;;  %s2654_s29 = int_to_ptr.vmem [resolvable:$true] %s2653_s29  ;;  %s2656_s24 = int_to_ptr.hbm [resolvable:$true] %s2655_s24 }
 0x300   : > { %s2624_s16 = scalar_lea.sflag [#allocation5], %s4601_s9  ;;  %s3453_s25 = sshra.s32 %s2656_s24, 4  ;;  %s3454_s25 = int_to_ptr.hbm [resolvable:$true] %s3453_s25 }
 0x301   : > { %v2480_v3 = vrot.slane %v2479_v29, 1  ;;  %v2548_v52 = vadd.f32 %v2547_v50, %v2546_v12  ;;  %s3455_s27 = scalar_lea.hbm %s3454_s25, 2  ;;  %s3459_s5 = scalar_lea.hbm %s4756_s3, 4 }
 0x302   : > { %p3456_p4 = scmp.ne.s32.totalorder %s3454_s25, %s3455_s27  ;;  %p3460_p9 = scmp.lt.s32.totalorder %s3454_s25, %s4756_s3 }
 0x303   : > { %v2549_v7 = vrot.slane %v2548_v52, 1  ;;  %v2481_v33 = vadd.f32 %v2480_v3, %v2479_v29  ;;  %p3461_p10 = scmp.lt.s32.totalorder %s3459_s5, %s3455_s27 }
 0x304   : > { %p3457_p7 = pnand %p3456_p4, %p3567_p5 }
 0x305   : > { %v2550_v48 = vadd.f32 %v2549_v7, %v2548_v52  ;;  %p3462_p11 = por %p3461_p10, %p3460_p9 }
 0x306   : > { %p3458_p8 = pneg %p3457_p7 }
 0x307   : > { %v2552_v37 = vsel %vm2551_vm6, %v2481_v33, %v2550_v48 }
 0x308   : > { %2553 = vst [vmem:[%s174_s28] sm:$0x3] %v2552_v37  ;;  %p3463_p12 = pnand %p3462_p11, %p3458_p8 }
 0x30a   : > { %3466 = shalt.err (!%p3463_p12)
}
 0x30b   : > { %3352 = dma.vmem_to_hbm [thread:$0]  (%p3567_p5), %s2654_s29, 32, %s2656_s24, %s2624_s16  }
 0x30c PF: > { %p3362_p13 = scmp.ge.s32.totalorder %s3505_s15, 2  ;;  %s2667_s9 = sand.u32 1, %s3493_s12  }
 0x30d   : > { %s2668_s8 = scalar_lea.sflag [#allocation3], %s2667_s9 }
 0x30e   : > { %p3356_p0 = pnand %p3362_p13, %p3571_p6 }
 0x310   : > { %p3357_p1 = pneg %p3356_p0 }
 0x312   : > { %3484 = dma.done.wait (%p3357_p1), %s2668_s8, 2048  }
 0x313   : > { %3486 = vsyncadd (%p3357_p1), %s2668_s8, 4294965248  ;;  %s2678_s10 = scalar_lea.sflag [#allocation5], %s2667_s9 }
 0x314   : > { %3488 = dma.done.wait (%p3357_p1), %s2678_s10, 32  }
 0x315   : > { %3490 = vsyncadd (%p3357_p1), %s2678_s10, 4294967264  ;;  %p17_p5 = scmp.ge.s32.totalorder %s3554_s18, 4   ;;  %s4845_s12 = smov %s3497_s13 }
 0x316   : > { %s4846_s13 = smov %s3501_s14  ;;  %s4847_s14 = smov %s3565_s21 }
 0x317   : > { %s4848_s15 = smov %s3554_s18  ;;  %19 = sbr.rel (!%p17_p5) target bundleno = 5 (0x5), region = 80 }
 0x31c   :  { %2684 = vsyncpa [#allocation3], 1 }
 0x31d   :  { %2686 = vsyncpa [#allocation3 + $0x1], 1 }
 0x31e   :  { %2687 = vsyncpa [#allocation5], 1 }
 0x31f   :  { %2689 = vsyncpa [#allocation5 + $0x1], 1 }

</bundles_post_ra>
